<compile_context>
chip_gen: v7x
topology: tpu7x:2x2x1
jax: 0.10.0
libtpu: 0.0.40
codegen_flags: <defaults>
</compile_context>

<pallas_src>
import jax
import jax.numpy as jnp
from jax.experimental import pallas as pl
from jax.experimental.pallas import tpu as pltpu

_PAD = 8  # halo rows above/below the scratch interiors (multiple of 8)


# ---------------------------------------------------------------------------
# Fused Inception kernel
# ---------------------------------------------------------------------------
def _make_inception_kernel(H, W, cin, ch1, c2r, c2, c3r, c3, c4):
    """Builds the fused kernel with all sizes baked in as Python ints."""
    LANES = W * (c2r + c3r)          # shared reduce-scratch lane width
    XLANES = (W + 2) * cin           # -inf pool scratch lane width

    def kernel(x_ref,
               wpre_ref, bpre_ref,           # fused 1x1 [b1 | b2-red | b3-red]
               w2b_ref, w3b_ref,             # banded 3x3 / 5x5 weights (per dy)
               w4_ref, bpost_ref,            # pool-proj 1x1 weight, packed biases
               o1_ref, o2_ref, o3_ref, o4_ref,
               pad_ref, xp_ref):
        xr = x_ref[0]                                      # (H, W*cin) lane-dense

        # ---- fused 1x1 convs: branch1 + branch2-reduce + branch3-reduce ----
        fused = jnp.dot(xr, wpre_ref[...], preferred_element_type=jnp.float32)
        fused = jnp.maximum(fused + bpre_ref[...], 0.0)    # (H, W*(ch1+c2r+c3r))
        o1_ref[0] = fused[:, :W * ch1]                     # vreg-aligned slice

        # ---- stage [t2 | t3] in a zero-row-padded scratch -------------------
        # Only the 8-row halo blocks are re-zeroed (aligned stores); the
        # interior is overwritten every step.  Zeroing every step keeps the
        # scratch valid even when the "parallel" grid is split across cores.
        pad_ref[0:_PAD, :] = jnp.zeros((_PAD, LANES), jnp.float32)
        pad_ref[_PAD + H:_PAD + H + _PAD, :] = jnp.zeros((_PAD, LANES), jnp.float32)
        pad_ref[_PAD:_PAD + H, :] = fused[:, W * ch1:]     # interior, row-aligned

        # ---- branch 2: 3x3 conv (pad 1) as 3 banded matmuls -----------------
        acc2 = jnp.zeros((H, W * c2), jnp.float32)
        for dy in range(3):
            slab = pad_ref[_PAD - 1 + dy:_PAD - 1 + dy + H, :]   # lane offset 0
            acc2 = acc2 + jnp.dot(slab, w2b_ref[dy],
                                  preferred_element_type=jnp.float32)
        o2_ref[0] = jnp.maximum(acc2 + bpost_ref[:, 0:W * c2], 0.0)

        # ---- branch 3: 5x5 conv (pad 2) as 5 banded matmuls -----------------
        acc3 = jnp.zeros((H, W * c3), jnp.float32)
        for dy in range(5):
            slab = pad_ref[_PAD - 2 + dy:_PAD - 2 + dy + H, :]
            acc3 = acc3 + jnp.dot(slab, w3b_ref[dy],
                                  preferred_element_type=jnp.float32)
        o3_ref[0] = jnp.maximum(acc3 + bpost_ref[:, W * c2:W * (c2 + c3)], 0.0)

        # ---- branch 4: separable 3x3/s1/p1 maxpool -> 1x1 conv --------------
        neg = -jnp.inf
        # Fill only the -inf halo strips that are actually read.
        xp_ref[_PAD - 1:_PAD, :] = jnp.full((1, XLANES), neg, jnp.float32)
        xp_ref[_PAD + H:_PAD + H + 1, :] = jnp.full((1, XLANES), neg, jnp.float32)
        xp_ref[_PAD:_PAD + H, 0:cin] = jnp.full((H, cin), neg, jnp.float32)
        xp_ref[_PAD:_PAD + H, (W + 1) * cin:] = jnp.full((H, cin), neg, jnp.float32)
        xp_ref[_PAD:_PAD + H, cin:(W + 1) * cin] = xr
        # Vertical max: 3 full-width, lane-aligned row slabs.
        vmax = xp_ref[_PAD - 1:_PAD - 1 + H, :]
        vmax = jnp.maximum(vmax, xp_ref[_PAD:_PAD + H, :])
        vmax = jnp.maximum(vmax, xp_ref[_PAD + 1:_PAD + 1 + H, :])
        # Horizontal max: 3 pixel-shifted column windows (2 unaligned slices).
        pooled = jnp.maximum(
            jnp.maximum(vmax[:, 0:W * cin], vmax[:, cin:(W + 1) * cin]),
            vmax[:, 2 * cin:(W + 2) * cin])
        br4 = jnp.dot(pooled, w4_ref[...], preferred_element_type=jnp.float32)
        o4_ref[0] = jnp.maximum(br4 + bpost_ref[:, W * (c2 + c3):], 0.0)

    return kernel


# ---------------------------------------------------------------------------
# Wrapper-side weight preparation (lane-dense block / banded weights)
# ---------------------------------------------------------------------------
def _block_diag(w, width):
    """(Cin, Cout) -> (width*Cin, width*Cout) block-diagonal matrix."""
    cin, cout = w.shape
    eye = jnp.eye(width, dtype=w.dtype)
    return jnp.einsum("ab,ij->aibj", eye, w).reshape(width * cin, width * cout)


def _banded_weight(w, width):
    """(kh, kw, Cin, Cout) -> (kh, width*Cin, width*Cout): kw taps folded into
    bands; zero-padding at the left/right image edges is implicit."""
    kh, kw, cin, cout = w.shape
    pad = (kw - 1) // 2
    xi = jnp.arange(width).reshape(width, 1, 1)
    xo = jnp.arange(width).reshape(1, width, 1)
    dx = jnp.arange(kw).reshape(1, 1, kw)
    sel = (xi == xo + dx - pad).astype(w.dtype)             # (W, W, kw)
    band = jnp.einsum("iok,hkcd->hicod", sel, w)            # (kh, W, cin, W, cout)
    return band.reshape(kh, width * cin, width * cout)


def _tile_bias(b, width):
    """(Cout,) -> (1, width*Cout) bias repeated once per pixel column."""
    return jnp.tile(b, width).reshape(1, width * b.shape[0])


# ---------------------------------------------------------------------------
# Inception module (parameters + forward)
# ---------------------------------------------------------------------------
def init_params(key, in_channels, ch1x1, ch3x3red, ch3x3,
                ch5x5red, ch5x5, pool_proj):
    """Deterministic parameter init. Weights stored HWIO, biases (Cout,)."""
    def conv_params(k, cin, cout, ksz):
        kw_, kb_ = jax.random.split(k)
        fan_in = cin * ksz * ksz
        bound = 1.0 / jnp.sqrt(fan_in)
        w = jax.random.uniform(kw_, (ksz, ksz, cin, cout),
                               jnp.float32, -bound, bound)
        b = jax.random.uniform(kb_, (cout,), jnp.float32, -bound, bound)
        return w, b

    keys = jax.random.split(key, 6)
    return {
        "b1": conv_params(keys[0], in_channels, ch1x1, 1),
        "b2a": conv_params(keys[1], in_channels, ch3x3red, 1),
        "b2b": conv_params(keys[2], ch3x3red, ch3x3, 3),
        "b3a": conv_params(keys[3], in_channels, ch5x5red, 1),
        "b3b": conv_params(keys[4], ch5x5red, ch5x5, 5),
        "b4": conv_params(keys[5], in_channels, pool_proj, 1),
    }


def inception_forward(params, x_nchw):
    """Matches Inception.forward: NCHW in, NCHW out (channel concat)."""
    N, cin, H, W = x_nchw.shape
    w1, b1 = params["b1"]
    w2a, b2a = params["b2a"]
    w2b, b2b = params["b2b"]
    w3a, b3a = params["b3a"]
    w3b, b3b = params["b3b"]
    w4, b4 = params["b4"]
    ch1 = w1.shape[-1]
    c2r, c2 = w2a.shape[-1], w2b.shape[-1]
    c3r, c3 = w3a.shape[-1], w3b.shape[-1]
    c4 = w4.shape[-1]

    # NCHW -> lane-dense (N, H, W*Cin).  Tiny one-off layout change in XLA.
    x_flat = jnp.transpose(x_nchw, (0, 2, 3, 1)).astype(jnp.float32)
    x_flat = x_flat.reshape(N, H, W * cin)

    # Fused 1x1 weight/bias: output lanes = [branch1 | branch2-red | branch3-red].
    w_pre = jnp.concatenate([_block_diag(w1[0, 0], W),
                             _block_diag(w2a[0, 0], W),
                             _block_diag(w3a[0, 0], W)], axis=1)
    b_pre = jnp.concatenate([_tile_bias(b1, W), _tile_bias(b2a, W),
                             _tile_bias(b3a, W)], axis=1)

    # Banded 3x3 / 5x5 weights operating on the shared [t2 | t3] scratch slab:
    # rows [0, W*c2r) address t2, rows [W*c2r, W*(c2r+c3r)) address t3.
    w2b_band = _banded_weight(w2b, W)                               # (3, W*c2r, W*c2)
    w3b_band = _banded_weight(w3b, W)                               # (5, W*c3r, W*c3)
    w2b_full = jnp.concatenate(
        [w2b_band, jnp.zeros((3, W * c3r, W * c2), jnp.float32)], axis=1)
    w3b_full = jnp.concatenate(
        [jnp.zeros((5, W * c2r, W * c3), jnp.float32), w3b_band], axis=1)

    w4_bd = _block_diag(w4[0, 0], W)
    b_post = jnp.concatenate([_tile_bias(b2b, W), _tile_bias(b3b, W),
                              _tile_bias(b4, W)], axis=1)

    kernel = _make_inception_kernel(H, W, cin, ch1, c2r, c2, c3r, c3, c4)

    def full_spec(shape):
        nd = len(shape)
        return pl.BlockSpec(shape, lambda n: (0,) * nd)

    def batch_spec(c):
        return pl.BlockSpec((1, H, W * c), lambda n: (n, 0, 0))

    pad_rows = _PAD + H + _PAD
    o1, o2, o3, o4 = pl.pallas_call(
        kernel,
        out_shape=(
            jax.ShapeDtypeStruct((N, H, W * ch1), jnp.float32),
            jax.ShapeDtypeStruct((N, H, W * c2), jnp.float32),
            jax.ShapeDtypeStruct((N, H, W * c3), jnp.float32),
            jax.ShapeDtypeStruct((N, H, W * c4), jnp.float32),
        ),
        grid=(N,),
        in_specs=[
            batch_spec(cin),
            full_spec(w_pre.shape), full_spec(b_pre.shape),
            full_spec(w2b_full.shape), full_spec(w3b_full.shape),
            full_spec(w4_bd.shape), full_spec(b_post.shape),
        ],
        out_specs=(
            batch_spec(ch1), batch_spec(c2), batch_spec(c3), batch_spec(c4),
        ),
        scratch_shapes=[
            pltpu.VMEM((pad_rows, W * (c2r + c3r)), jnp.float32),  # zero-pad [t2|t3]
            pltpu.VMEM((pad_rows, (W + 2) * cin), jnp.float32),    # -inf pool pad
        ],
        compiler_params=pltpu.CompilerParams(
            dimension_semantics=("parallel",)),
    )(x_flat, w_pre, b_pre, w2b_full, w3b_full, w4_bd, b_post)

    # Un-flatten the lane-dense outputs and concatenate channels (tiny XLA ops).
    out = jnp.concatenate([
        o1.reshape(N, H, W, ch1),
        o2.reshape(N, H, W, c2),
        o3.reshape(N, H, W, c3),
        o4.reshape(N, H, W, c4),
    ], axis=-1)
    return jnp.transpose(out, (0, 3, 1, 2))                # -> NCHW


# ---------------------------------------------------------------------------
# Pure-JAX reference (for correctness check only)
# ---------------------------------------------------------------------------
def _ref_conv_relu(x, w, b, pad):
    y = jax.lax.conv_general_dilated(
        x, w, window_strides=(1, 1), padding=[(pad, pad), (pad, pad)],
        dimension_numbers=("NHWC", "HWIO", "NHWC"))
    return jnp.maximum(y + b.reshape(1, 1, 1, -1), 0.0)


def _ref_forward(params, x_nchw):
    x = jnp.transpose(x_nchw, (0, 2, 3, 1)).astype(jnp.float32)
    br1 = _ref_conv_relu(x, *params["b1"], pad=0)
    br2 = _ref_conv_relu(_ref_conv_relu(x, *params["b2a"], pad=0),
                         *params["b2b"], pad=1)
    br3 = _ref_conv_relu(_ref_conv_relu(x, *params["b3a"], pad=0),
                         *params["b3b"], pad=2)
    pooled = jax.lax.reduce_window(
        x, -jnp.inf, jax.lax.max, (1, 3, 3, 1), (1, 1, 1, 1),
        [(0, 0), (1, 1), (1, 1), (0, 0)])
    br4 = _ref_conv_relu(pooled, *params["b4"], pad=0)
    out = jnp.concatenate([br1, br2, br3, br4], axis=-1)
    return jnp.transpose(out, (0, 3, 1, 2))


# ---------------------------------------------------------------------------
if __name__ == "__main__":
    key = jax.random.PRNGKey(0)
    kx, kp = jax.random.split(key)

    # Small shapes consistent with the module:
    N, C_in, H, W = 2, 4, 16, 16
    ch1x1, ch3x3red, ch3x3, ch5x5red, ch5x5, pool_proj = 8, 4, 8, 4, 8, 8

    x = jax.random.normal(kx, (N, C_in, H, W), jnp.float32)
    params = init_params(kp, C_in, ch1x1, ch3x3red, ch3x3,
                         ch5x5red, ch5x5, pool_proj)

    out = jax.block_until_ready(jax.jit(inception_forward)(params, x))
    assert out.shape == (N, ch1x1 + ch3x3 + ch5x5 + pool_proj, H, W), out.shape

    ref = jax.block_until_ready(_ref_forward(params, x))
    assert jnp.allclose(out, ref, atol=1e-4, rtol=1e-4), \
        float(jnp.max(jnp.abs(out - ref)))

    print("KERNEL_OK")
</pallas_src>

<mosaic_0001>
module attributes {stable_mosaic.version = 11 : i64} {
  func.func @kernel(%arg0: i32, %arg1: memref<1x16x64xf32, #tpu.memory_space<vmem>>, %arg2: memref<64x256xf32, #tpu.memory_space<vmem>>, %arg3: memref<1x256xf32, #tpu.memory_space<vmem>>, %arg4: memref<3x128x128xf32, #tpu.memory_space<vmem>>, %arg5: memref<5x128x128xf32, #tpu.memory_space<vmem>>, %arg6: memref<64x128xf32, #tpu.memory_space<vmem>>, %arg7: memref<1x384xf32, #tpu.memory_space<vmem>>, %arg8: memref<1x16x128xf32, #tpu.memory_space<vmem>>, %arg9: memref<1x16x128xf32, #tpu.memory_space<vmem>>, %arg10: memref<1x16x128xf32, #tpu.memory_space<vmem>>, %arg11: memref<1x16x128xf32, #tpu.memory_space<vmem>>, %arg12: memref<32x128xf32, #tpu.memory_space<vmem>>, %arg13: memref<32x72xf32, #tpu.memory_space<vmem>>) attributes {dimension_semantics = [#tpu.dimension_semantics<parallel>], iteration_bounds = array<i64: 2>, scalar_prefetch = 0 : i64, scratch_operands = 2 : i64, tpu.core_type = #tpu.core_type<tc>, window_params = [{transform_indices = @transform_0, window_bounds = array<i64: 1, 16, 64>}, {pipeline_mode = #tpu.pipeline_mode<synchronous>, transform_indices = @transform_1, window_bounds = array<i64: 64, 256>}, {pipeline_mode = #tpu.pipeline_mode<synchronous>, transform_indices = @transform_2, window_bounds = array<i64: 1, 256>}, {pipeline_mode = #tpu.pipeline_mode<synchronous>, transform_indices = @transform_3, window_bounds = array<i64: 3, 128, 128>}, {pipeline_mode = #tpu.pipeline_mode<synchronous>, transform_indices = @transform_4, window_bounds = array<i64: 5, 128, 128>}, {pipeline_mode = #tpu.pipeline_mode<synchronous>, transform_indices = @transform_5, window_bounds = array<i64: 64, 128>}, {pipeline_mode = #tpu.pipeline_mode<synchronous>, transform_indices = @transform_6, window_bounds = array<i64: 1, 384>}, {transform_indices = @transform_7, window_bounds = array<i64: 1, 16, 128>}, {transform_indices = @transform_8, window_bounds = array<i64: 1, 16, 128>}, {transform_indices = @transform_9, window_bounds = array<i64: 1, 16, 128>}, {transform_indices = @transform_10, window_bounds = array<i64: 1, 16, 128>}]} {
    %c0 = arith.constant 0 : index
    %c0_0 = arith.constant 0 : index
    %c0_1 = arith.constant 0 : index
    %0 = vector.load %arg1[%c0, %c0_0, %c0_1] : memref<1x16x64xf32, #tpu.memory_space<vmem>>, vector<1x16x64xf32>
    %1 = vector.shape_cast %0 : vector<1x16x64xf32> to vector<16x64xf32>
    %c0_2 = arith.constant 0 : index
    %c0_3 = arith.constant 0 : index
    %2 = vector.load %arg2[%c0_2, %c0_3] : memref<64x256xf32, #tpu.memory_space<vmem>>, vector<64x256xf32>
    %cst = arith.constant dense<0.000000e+00> : vector<16x256xf32>
    %3 = tpu.matmul %1, %2, %cst {dimension_numbers = #tpu.dot_dimension_numbers<[1], [0], [0], [1], [0, 0, 1, 1], [], []>} : vector<16x64xf32>, vector<64x256xf32>, vector<16x256xf32> -> vector<16x256xf32>
    %c0_4 = arith.constant 0 : index
    %c0_5 = arith.constant 0 : index
    %4 = vector.load %arg3[%c0_4, %c0_5] : memref<1x256xf32, #tpu.memory_space<vmem>>, vector<1x256xf32>
    %5 = vector.broadcast %4 : vector<1x256xf32> to vector<16x256xf32>
    %6 = arith.addf %3, %5 : vector<16x256xf32>
    %cst_6 = arith.constant 0.000000e+00 : f32
    %7 = vector.broadcast %cst_6 : f32 to vector<16x256xf32>
    %8 = arith.maximumf %6, %7 : vector<16x256xf32>
    %9 = vector.extract_strided_slice %8 {offsets = [0, 0], sizes = [16, 128], strides = [1, 1]} : vector<16x256xf32> to vector<16x128xf32>
    %c0_7 = arith.constant 0 : index
    %c0_8 = arith.constant 0 : index
    %c0_9 = arith.constant 0 : index
    %10 = vector.load %arg8[%c0_7, %c0_8, %c0_9] : memref<1x16x128xf32, #tpu.memory_space<vmem>>, vector<1x16x128xf32>
    %11 = vector.shape_cast %10 : vector<1x16x128xf32> to vector<16x128xf32>
    %12 = vector.shape_cast %9 : vector<16x128xf32> to vector<1x16x128xf32>
    tpu.vector_store %arg8[%c0_7, %c0_8, %c0_9], %12 {strides = array<i32>} : memref<1x16x128xf32, #tpu.memory_space<vmem>>, vector<1x16x128xf32>,
    %cst_10 = arith.constant 0.000000e+00 : f32
    %13 = vector.broadcast %cst_10 : f32 to vector<8x128xf32>
    %c0_11 = arith.constant 0 : index
    %c0_12 = arith.constant 0 : index
    %14 = vector.load %arg12[%c0_11, %c0_12] : memref<32x128xf32, #tpu.memory_space<vmem>>, vector<8x128xf32>
    tpu.vector_store %arg12[%c0_11, %c0_12], %13 {strides = array<i32>} : memref<32x128xf32, #tpu.memory_space<vmem>>, vector<8x128xf32>,
    %cst_13 = arith.constant 0.000000e+00 : f32
    %15 = vector.broadcast %cst_13 : f32 to vector<8x128xf32>
    %c24 = arith.constant 24 : index
    %c0_14 = arith.constant 0 : index
    %16 = vector.load %arg12[%c24, %c0_14] : memref<32x128xf32, #tpu.memory_space<vmem>>, vector<8x128xf32>
    tpu.vector_store %arg12[%c24, %c0_14], %15 {strides = array<i32>} : memref<32x128xf32, #tpu.memory_space<vmem>>, vector<8x128xf32>,
    %17 = vector.extract_strided_slice %8 {offsets = [0, 128], sizes = [16, 128], strides = [1, 1]} : vector<16x256xf32> to vector<16x128xf32>
    %c8 = arith.constant 8 : index
    %c0_15 = arith.constant 0 : index
    %18 = vector.load %arg12[%c8, %c0_15] : memref<32x128xf32, #tpu.memory_space<vmem>>, vector<16x128xf32>
    tpu.vector_store %arg12[%c8, %c0_15], %17 {strides = array<i32>} : memref<32x128xf32, #tpu.memory_space<vmem>>, vector<16x128xf32>,
    %cst_16 = arith.constant 0.000000e+00 : f32
    %19 = vector.broadcast %cst_16 : f32 to vector<16x128xf32>
    %c7 = arith.constant 7 : index
    %c0_17 = arith.constant 0 : index
    %20 = vector.load %arg12[%c7, %c0_17] : memref<32x128xf32, #tpu.memory_space<vmem>>, vector<16x128xf32>
    %c0_18 = arith.constant 0 : index
    %c0_19 = arith.constant 0 : index
    %c0_20 = arith.constant 0 : index
    %21 = vector.load %arg4[%c0_18, %c0_19, %c0_20] : memref<3x128x128xf32, #tpu.memory_space<vmem>>, vector<1x128x128xf32>
    %22 = vector.shape_cast %21 : vector<1x128x128xf32> to vector<128x128xf32>
    %cst_21 = arith.constant dense<0.000000e+00> : vector<16x128xf32>
    %23 = tpu.matmul %20, %22, %cst_21 {dimension_numbers = #tpu.dot_dimension_numbers<[1], [0], [0], [1], [0, 0, 1, 1], [], []>} : vector<16x128xf32>, vector<128x128xf32>, vector<16x128xf32> -> vector<16x128xf32>
    %24 = arith.addf %19, %23 : vector<16x128xf32>
    %c8_22 = arith.constant 8 : index
    %c0_23 = arith.constant 0 : index
    %25 = vector.load %arg12[%c8_22, %c0_23] : memref<32x128xf32, #tpu.memory_space<vmem>>, vector<16x128xf32>
    %c1 = arith.constant 1 : index
    %c0_24 = arith.constant 0 : index
    %c0_25 = arith.constant 0 : index
    %26 = vector.load %arg4[%c1, %c0_24, %c0_25] : memref<3x128x128xf32, #tpu.memory_space<vmem>>, vector<1x128x128xf32>
    %27 = vector.shape_cast %26 : vector<1x128x128xf32> to vector<128x128xf32>
    %cst_26 = arith.constant dense<0.000000e+00> : vector<16x128xf32>
    %28 = tpu.matmul %25, %27, %cst_26 {dimension_numbers = #tpu.dot_dimension_numbers<[1], [0], [0], [1], [0, 0, 1, 1], [], []>} : vector<16x128xf32>, vector<128x128xf32>, vector<16x128xf32> -> vector<16x128xf32>
    %29 = arith.addf %24, %28 : vector<16x128xf32>
    %c9 = arith.constant 9 : index
    %c0_27 = arith.constant 0 : index
    %30 = vector.load %arg12[%c9, %c0_27] : memref<32x128xf32, #tpu.memory_space<vmem>>, vector<16x128xf32>
    %c2 = arith.constant 2 : index
    %c0_28 = arith.constant 0 : index
    %c0_29 = arith.constant 0 : index
    %31 = vector.load %arg4[%c2, %c0_28, %c0_29] : memref<3x128x128xf32, #tpu.memory_space<vmem>>, vector<1x128x128xf32>
    %32 = vector.shape_cast %31 : vector<1x128x128xf32> to vector<128x128xf32>
    %cst_30 = arith.constant dense<0.000000e+00> : vector<16x128xf32>
    %33 = tpu.matmul %30, %32, %cst_30 {dimension_numbers = #tpu.dot_dimension_numbers<[1], [0], [0], [1], [0, 0, 1, 1], [], []>} : vector<16x128xf32>, vector<128x128xf32>, vector<16x128xf32> -> vector<16x128xf32>
    %34 = arith.addf %29, %33 : vector<16x128xf32>
    %c0_31 = arith.constant 0 : index
    %c0_32 = arith.constant 0 : index
    %35 = vector.load %arg7[%c0_31, %c0_32] : memref<1x384xf32, #tpu.memory_space<vmem>>, vector<1x128xf32>
    %36 = vector.broadcast %35 : vector<1x128xf32> to vector<16x128xf32>
    %37 = arith.addf %34, %36 : vector<16x128xf32>
    %cst_33 = arith.constant 0.000000e+00 : f32
    %38 = vector.broadcast %cst_33 : f32 to vector<16x128xf32>
    %39 = arith.maximumf %37, %38 : vector<16x128xf32>
    %c0_34 = arith.constant 0 : index
    %c0_35 = arith.constant 0 : index
    %c0_36 = arith.constant 0 : index
    %40 = vector.load %arg9[%c0_34, %c0_35, %c0_36] : memref<1x16x128xf32, #tpu.memory_space<vmem>>, vector<1x16x128xf32>
    %41 = vector.shape_cast %40 : vector<1x16x128xf32> to vector<16x128xf32>
    %42 = vector.shape_cast %39 : vector<16x128xf32> to vector<1x16x128xf32>
    tpu.vector_store %arg9[%c0_34, %c0_35, %c0_36], %42 {strides = array<i32>} : memref<1x16x128xf32, #tpu.memory_space<vmem>>, vector<1x16x128xf32>,
    %cst_37 = arith.constant 0.000000e+00 : f32
    %43 = vector.broadcast %cst_37 : f32 to vector<16x128xf32>
    %c6 = arith.constant 6 : index
    %c0_38 = arith.constant 0 : index
    %44 = vector.load %arg12[%c6, %c0_38] : memref<32x128xf32, #tpu.memory_space<vmem>>, vector<16x128xf32>
    %c0_39 = arith.constant 0 : index
    %c0_40 = arith.constant 0 : index
    %c0_41 = arith.constant 0 : index
    %45 = vector.load %arg5[%c0_39, %c0_40, %c0_41] : memref<5x128x128xf32, #tpu.memory_space<vmem>>, vector<1x128x128xf32>
    %46 = vector.shape_cast %45 : vector<1x128x128xf32> to vector<128x128xf32>
    %cst_42 = arith.constant dense<0.000000e+00> : vector<16x128xf32>
    %47 = tpu.matmul %44, %46, %cst_42 {dimension_numbers = #tpu.dot_dimension_numbers<[1], [0], [0], [1], [0, 0, 1, 1], [], []>} : vector<16x128xf32>, vector<128x128xf32>, vector<16x128xf32> -> vector<16x128xf32>
    %48 = arith.addf %43, %47 : vector<16x128xf32>
    %c7_43 = arith.constant 7 : index
    %c0_44 = arith.constant 0 : index
    %49 = vector.load %arg12[%c7_43, %c0_44] : memref<32x128xf32, #tpu.memory_space<vmem>>, vector<16x128xf32>
    %c1_45 = arith.constant 1 : index
    %c0_46 = arith.constant 0 : index
    %c0_47 = arith.constant 0 : index
    %50 = vector.load %arg5[%c1_45, %c0_46, %c0_47] : memref<5x128x128xf32, #tpu.memory_space<vmem>>, vector<1x128x128xf32>
    %51 = vector.shape_cast %50 : vector<1x128x128xf32> to vector<128x128xf32>
    %cst_48 = arith.constant dense<0.000000e+00> : vector<16x128xf32>
    %52 = tpu.matmul %49, %51, %cst_48 {dimension_numbers = #tpu.dot_dimension_numbers<[1], [0], [0], [1], [0, 0, 1, 1], [], []>} : vector<16x128xf32>, vector<128x128xf32>, vector<16x128xf32> -> vector<16x128xf32>
    %53 = arith.addf %48, %52 : vector<16x128xf32>
    %c8_49 = arith.constant 8 : index
    %c0_50 = arith.constant 0 : index
    %54 = vector.load %arg12[%c8_49, %c0_50] : memref<32x128xf32, #tpu.memory_space<vmem>>, vector<16x128xf32>
    %c2_51 = arith.constant 2 : index
    %c0_52 = arith.constant 0 : index
    %c0_53 = arith.constant 0 : index
    %55 = vector.load %arg5[%c2_51, %c0_52, %c0_53] : memref<5x128x128xf32, #tpu.memory_space<vmem>>, vector<1x128x128xf32>
    %56 = vector.shape_cast %55 : vector<1x128x128xf32> to vector<128x128xf32>
    %cst_54 = arith.constant dense<0.000000e+00> : vector<16x128xf32>
    %57 = tpu.matmul %54, %56, %cst_54 {dimension_numbers = #tpu.dot_dimension_numbers<[1], [0], [0], [1], [0, 0, 1, 1], [], []>} : vector<16x128xf32>, vector<128x128xf32>, vector<16x128xf32> -> vector<16x128xf32>
    %58 = arith.addf %53, %57 : vector<16x128xf32>
    %c9_55 = arith.constant 9 : index
    %c0_56 = arith.constant 0 : index
    %59 = vector.load %arg12[%c9_55, %c0_56] : memref<32x128xf32, #tpu.memory_space<vmem>>, vector<16x128xf32>
    %c3 = arith.constant 3 : index
    %c0_57 = arith.constant 0 : index
    %c0_58 = arith.constant 0 : index
    %60 = vector.load %arg5[%c3, %c0_57, %c0_58] : memref<5x128x128xf32, #tpu.memory_space<vmem>>, vector<1x128x128xf32>
    %61 = vector.shape_cast %60 : vector<1x128x128xf32> to vector<128x128xf32>
    %cst_59 = arith.constant dense<0.000000e+00> : vector<16x128xf32>
    %62 = tpu.matmul %59, %61, %cst_59 {dimension_numbers = #tpu.dot_dimension_numbers<[1], [0], [0], [1], [0, 0, 1, 1], [], []>} : vector<16x128xf32>, vector<128x128xf32>, vector<16x128xf32> -> vector<16x128xf32>
    %63 = arith.addf %58, %62 : vector<16x128xf32>
    %c10 = arith.constant 10 : index
    %c0_60 = arith.constant 0 : index
    %64 = vector.load %arg12[%c10, %c0_60] : memref<32x128xf32, #tpu.memory_space<vmem>>, vector<16x128xf32>
    %c4 = arith.constant 4 : index
    %c0_61 = arith.constant 0 : index
    %c0_62 = arith.constant 0 : index
    %65 = vector.load %arg5[%c4, %c0_61, %c0_62] : memref<5x128x128xf32, #tpu.memory_space<vmem>>, vector<1x128x128xf32>
    %66 = vector.shape_cast %65 : vector<1x128x128xf32> to vector<128x128xf32>
    %cst_63 = arith.constant dense<0.000000e+00> : vector<16x128xf32>
    %67 = tpu.matmul %64, %66, %cst_63 {dimension_numbers = #tpu.dot_dimension_numbers<[1], [0], [0], [1], [0, 0, 1, 1], [], []>} : vector<16x128xf32>, vector<128x128xf32>, vector<16x128xf32> -> vector<16x128xf32>
    %68 = arith.addf %63, %67 : vector<16x128xf32>
    %c0_64 = arith.constant 0 : index
    %c128 = arith.constant 128 : index
    %69 = vector.load %arg7[%c0_64, %c128] : memref<1x384xf32, #tpu.memory_space<vmem>>, vector<1x128xf32>
    %70 = vector.broadcast %69 : vector<1x128xf32> to vector<16x128xf32>
    %71 = arith.addf %68, %70 : vector<16x128xf32>
    %cst_65 = arith.constant 0.000000e+00 : f32
    %72 = vector.broadcast %cst_65 : f32 to vector<16x128xf32>
    %73 = arith.maximumf %71, %72 : vector<16x128xf32>
    %c0_66 = arith.constant 0 : index
    %c0_67 = arith.constant 0 : index
    %c0_68 = arith.constant 0 : index
    %74 = vector.load %arg10[%c0_66, %c0_67, %c0_68] : memref<1x16x128xf32, #tpu.memory_space<vmem>>, vector<1x16x128xf32>
    %75 = vector.shape_cast %74 : vector<1x16x128xf32> to vector<16x128xf32>
    %76 = vector.shape_cast %73 : vector<16x128xf32> to vector<1x16x128xf32>
    tpu.vector_store %arg10[%c0_66, %c0_67, %c0_68], %76 {strides = array<i32>} : memref<1x16x128xf32, #tpu.memory_space<vmem>>, vector<1x16x128xf32>,
    %cst_69 = arith.constant 0xFF800000 : f32
    %77 = vector.broadcast %cst_69 : f32 to vector<1x72xf32>
    %c7_70 = arith.constant 7 : index
    %c0_71 = arith.constant 0 : index
    %78 = vector.load %arg13[%c7_70, %c0_71] : memref<32x72xf32, #tpu.memory_space<vmem>>, vector<1x72xf32>
    tpu.vector_store %arg13[%c7_70, %c0_71], %77 {strides = array<i32>} : memref<32x72xf32, #tpu.memory_space<vmem>>, vector<1x72xf32>,
    %cst_72 = arith.constant 0xFF800000 : f32
    %79 = vector.broadcast %cst_72 : f32 to vector<1x72xf32>
    %c24_73 = arith.constant 24 : index
    %c0_74 = arith.constant 0 : index
    %80 = vector.load %arg13[%c24_73, %c0_74] : memref<32x72xf32, #tpu.memory_space<vmem>>, vector<1x72xf32>
    tpu.vector_store %arg13[%c24_73, %c0_74], %79 {strides = array<i32>} : memref<32x72xf32, #tpu.memory_space<vmem>>, vector<1x72xf32>,
    %cst_75 = arith.constant 0xFF800000 : f32
    %81 = vector.broadcast %cst_75 : f32 to vector<16x4xf32>
    %c8_76 = arith.constant 8 : index
    %c0_77 = arith.constant 0 : index
    %82 = vector.load %arg13[%c8_76, %c0_77] : memref<32x72xf32, #tpu.memory_space<vmem>>, vector<16x4xf32>
    tpu.vector_store %arg13[%c8_76, %c0_77], %81 {strides = array<i32>} : memref<32x72xf32, #tpu.memory_space<vmem>>, vector<16x4xf32>,
    %cst_78 = arith.constant 0xFF800000 : f32
    %83 = vector.broadcast %cst_78 : f32 to vector<16x4xf32>
    %c8_79 = arith.constant 8 : index
    %c68 = arith.constant 68 : index
    %84 = vector.load %arg13[%c8_79, %c68] : memref<32x72xf32, #tpu.memory_space<vmem>>, vector<16x4xf32>
    tpu.vector_store %arg13[%c8_79, %c68], %83 {strides = array<i32>} : memref<32x72xf32, #tpu.memory_space<vmem>>, vector<16x4xf32>,
    %c8_80 = arith.constant 8 : index
    %c4_81 = arith.constant 4 : index
    %85 = vector.load %arg13[%c8_80, %c4_81] : memref<32x72xf32, #tpu.memory_space<vmem>>, vector<16x64xf32>
    tpu.vector_store %arg13[%c8_80, %c4_81], %1 {strides = array<i32>} : memref<32x72xf32, #tpu.memory_space<vmem>>, vector<16x64xf32>,
    %c7_82 = arith.constant 7 : index
    %c0_83 = arith.constant 0 : index
    %86 = vector.load %arg13[%c7_82, %c0_83] : memref<32x72xf32, #tpu.memory_space<vmem>>, vector<16x72xf32>
    %c8_84 = arith.constant 8 : index
    %c0_85 = arith.constant 0 : index
    %87 = vector.load %arg13[%c8_84, %c0_85] : memref<32x72xf32, #tpu.memory_space<vmem>>, vector<16x72xf32>
    %88 = arith.maximumf %86, %87 : vector<16x72xf32>
    %c9_86 = arith.constant 9 : index
    %c0_87 = arith.constant 0 : index
    %89 = vector.load %arg13[%c9_86, %c0_87] : memref<32x72xf32, #tpu.memory_space<vmem>>, vector<16x72xf32>
    %90 = arith.maximumf %88, %89 : vector<16x72xf32>
    %91 = vector.extract_strided_slice %90 {offsets = [0, 0], sizes = [16, 64], strides = [1, 1]} : vector<16x72xf32> to vector<16x64xf32>
    %92 = vector.extract_strided_slice %90 {offsets = [0, 4], sizes = [16, 64], strides = [1, 1]} : vector<16x72xf32> to vector<16x64xf32>
    %93 = arith.maximumf %91, %92 : vector<16x64xf32>
    %94 = vector.extract_strided_slice %90 {offsets = [0, 8], sizes = [16, 64], strides = [1, 1]} : vector<16x72xf32> to vector<16x64xf32>
    %95 = arith.maximumf %93, %94 : vector<16x64xf32>
    %c0_88 = arith.constant 0 : index
    %c0_89 = arith.constant 0 : index
    %96 = vector.load %arg6[%c0_88, %c0_89] : memref<64x128xf32, #tpu.memory_space<vmem>>, vector<64x128xf32>
    %cst_90 = arith.constant dense<0.000000e+00> : vector<16x128xf32>
    %97 = tpu.matmul %95, %96, %cst_90 {dimension_numbers = #tpu.dot_dimension_numbers<[1], [0], [0], [1], [0, 0, 1, 1], [], []>} : vector<16x64xf32>, vector<64x128xf32>, vector<16x128xf32> -> vector<16x128xf32>
    %c0_91 = arith.constant 0 : index
    %c256 = arith.constant 256 : index
    %98 = vector.load %arg7[%c0_91, %c256] : memref<1x384xf32, #tpu.memory_space<vmem>>, vector<1x128xf32>
    %99 = vector.broadcast %98 : vector<1x128xf32> to vector<16x128xf32>
    %100 = arith.addf %97, %99 : vector<16x128xf32>
    %cst_92 = arith.constant 0.000000e+00 : f32
    %101 = vector.broadcast %cst_92 : f32 to vector<16x128xf32>
    %102 = arith.maximumf %100, %101 : vector<16x128xf32>
    %c0_93 = arith.constant 0 : index
    %c0_94 = arith.constant 0 : index
    %c0_95 = arith.constant 0 : index
    %103 = vector.load %arg11[%c0_93, %c0_94, %c0_95] : memref<1x16x128xf32, #tpu.memory_space<vmem>>, vector<1x16x128xf32>
    %104 = vector.shape_cast %103 : vector<1x16x128xf32> to vector<16x128xf32>
    %105 = vector.shape_cast %102 : vector<16x128xf32> to vector<1x16x128xf32>
    tpu.vector_store %arg11[%c0_93, %c0_94, %c0_95], %105 {strides = array<i32>} : memref<1x16x128xf32, #tpu.memory_space<vmem>>, vector<1x16x128xf32>,
    return
  }
  func.func @transform_0(%arg0: i32) -> (i32, i32, i32) {
    %c0_i32 = arith.constant 0 : i32
    %c0_i32_0 = arith.constant 0 : i32
    %c0_i32_1 = arith.constant 0 : i32
    return %arg0, %c0_i32, %c0_i32_0 : i32, i32, i32
  }
  func.func @transform_1(%arg0: i32) -> (i32, i32) {
    %c0_i32 = arith.constant 0 : i32
    %c0_i32_0 = arith.constant 0 : i32
    %c0_i32_1 = arith.constant 0 : i32
    return %c0_i32, %c0_i32_0 : i32, i32
  }
  func.func @transform_2(%arg0: i32) -> (i32, i32) {
    %c0_i32 = arith.constant 0 : i32
    %c0_i32_0 = arith.constant 0 : i32
    %c0_i32_1 = arith.constant 0 : i32
    return %c0_i32, %c0_i32_0 : i32, i32
  }
  func.func @transform_3(%arg0: i32) -> (i32, i32, i32) {
    %c0_i32 = arith.constant 0 : i32
    %c0_i32_0 = arith.constant 0 : i32
    %c0_i32_1 = arith.constant 0 : i32
    %c0_i32_2 = arith.constant 0 : i32
    return %c0_i32, %c0_i32_0, %c0_i32_1 : i32, i32, i32
  }
  func.func @transform_4(%arg0: i32) -> (i32, i32, i32) {
    %c0_i32 = arith.constant 0 : i32
    %c0_i32_0 = arith.constant 0 : i32
    %c0_i32_1 = arith.constant 0 : i32
    %c0_i32_2 = arith.constant 0 : i32
    return %c0_i32, %c0_i32_0, %c0_i32_1 : i32, i32, i32
  }
  func.func @transform_5(%arg0: i32) -> (i32, i32) {
    %c0_i32 = arith.constant 0 : i32
    %c0_i32_0 = arith.constant 0 : i32
    %c0_i32_1 = arith.constant 0 : i32
    return %c0_i32, %c0_i32_0 : i32, i32
  }
  func.func @transform_6(%arg0: i32) -> (i32, i32) {
    %c0_i32 = arith.constant 0 : i32
    %c0_i32_0 = arith.constant 0 : i32
    %c0_i32_1 = arith.constant 0 : i32
    return %c0_i32, %c0_i32_0 : i32, i32
  }
  func.func @transform_7(%arg0: i32) -> (i32, i32, i32) {
    %c0_i32 = arith.constant 0 : i32
    %c0_i32_0 = arith.constant 0 : i32
    %c0_i32_1 = arith.constant 0 : i32
    return %arg0, %c0_i32, %c0_i32_0 : i32, i32, i32
  }
  func.func @transform_8(%arg0: i32) -> (i32, i32, i32) {
    %c0_i32 = arith.constant 0 : i32
    %c0_i32_0 = arith.constant 0 : i32
    %c0_i32_1 = arith.constant 0 : i32
    return %arg0, %c0_i32, %c0_i32_0 : i32, i32, i32
  }
  func.func @transform_9(%arg0: i32) -> (i32, i32, i32) {
    %c0_i32 = arith.constant 0 : i32
    %c0_i32_0 = arith.constant 0 : i32
    %c0_i32_1 = arith.constant 0 : i32
    return %arg0, %c0_i32, %c0_i32_0 : i32, i32, i32
  }
  func.func @transform_10(%arg0: i32) -> (i32, i32, i32) {
    %c0_i32 = arith.constant 0 : i32
    %c0_i32_0 = arith.constant 0 : i32
    %c0_i32_1 = arith.constant 0 : i32
    return %arg0, %c0_i32, %c0_i32_0 : i32, i32, i32
  }
}

</mosaic_0001>

<bundles_post_ra>
// kernel: tile.48
= control target key start
LH: loop header
LB: loop body
LE: loop exit
PB: predicated region body
PF: predicated region fallthrough
CT: control target
= control target key end

     0   :  { %s28_s0 = inlined_call_operand.vmem [shape: f32[8], index: 0, kind: input, shape index: {}]   ;;  %s29_s1 = inlined_call_operand.vmem [shape: f32[16,8], index: 1, kind: output, shape index: {}]  }
   0x1   :  { %v4_v0 = vld [vmem:[%s28_s0] ss:$0 sm:$0xff] }
   0x2   :  { %5 = vst [vmem:[%s29_s1] sm:$0xff] %v4_v0  ;;  %8 = vst [vmem:[%s29_s1 + $0x8] sm:$0xff] %v4_v0 }

// kernel: tile.49
= control target key start
LH: loop header
LB: loop body
LE: loop exit
PB: predicated region body
PF: predicated region fallthrough
CT: control target
= control target key end

     0   :  { %s131_s10 = smov 120   ;;  %s132_s11 = smov 104   ;;  %vm3_vm0 = vcmask 64512   ;;  %vm9_vm1 = vcmask 1048512   ;;  %vm15_vm2 = vcmask 982912   ;;  %vm21_vm3 = vcmask 917312   ;;  %s207_s0 = inlined_call_operand.vmem [shape: f32[16,8], index: 0, kind: input, shape index: {}]   ;;  %s208_s1 = inlined_call_operand.vmem [shape: f32[1,128], index: 1, kind: output, shape index: {}]  }
   0x1   :  { %v101_v0 = vld [vmem:[%s207_s0 + $0xf] sm:$0x1]   ;;  %v103_v1 = vld [vmem:[%s207_s0 + $0xd] sm:$0x1]   ;;  %v102_v2 = vld [vmem:[%s207_s0 + $0xe] sm:$0x1]  }
   0x2   :  { %7 = vrot.lane.b32.xlu0 %v101_v0, %s131_s10  ;;  %19 = vrot.lane.b32.xlu1 %v103_v1, %s132_s11  ;;  %v104_v3 = vld [vmem:[%s207_s0 + $0xc] sm:$0x1]   ;;  %s133_s16 = smov 112   ;;  %s134_s17 = smov 96   ;;  %v105_v4 = vld [vmem:[%s207_s0 + $0xb] sm:$0x1]  }
   0x3   :  { %v106_v5 = vld [vmem:[%s207_s0 + $0xa] sm:$0x1]   ;;  %v2_v6 = vld [vmem:[%s207_s0] sm:$0x1]   ;;  %s135_s24 = smov 88   ;;  %s136_s25 = smov 80  }
   0x4   :  { %4 = vst.msk [vmem:[#allocation0] sm:$0x1] %vm3_vm0, %v2_v6   ;;  %v107_v7 = vld [vmem:[%s207_s0 + $0x9] sm:$0x1]   ;;  %v108_v8 = vld [vmem:[%s207_s0 + $0x8] sm:$0x1]  }
   0x5   :  { %s137_s30 = smov 72   ;;  %s138_s2 = smov 64   ;;  %v109_v9 = vld [vmem:[%s207_s0 + $0x7] sm:$0x1]   ;;  %v110_v10 = vld [vmem:[%s207_s0 + $0x6] sm:$0x1]  }
   0x6   :  { %13 = vrot.lane.b32.xlu0 %v102_v2, %s133_s16  ;;  %25 = vrot.lane.b32.xlu1 %v104_v3, %s134_s17  ;;  %s139_s7 = smov 56   ;;  %s140_s8 = smov 48   ;;  %v111_v11 = vld [vmem:[%s207_s0 + $0x5] sm:$0x1]   ;;  %v112_v12 = vld [vmem:[%s207_s0 + $0x4] sm:$0x1]  }
   0x7   :  { %s141_s13 = smov 40   ;;  %s142_s14 = smov 32   ;;  %v113_v13 = vld [vmem:[%s207_s0 + $0x3] sm:$0x1]   ;;  %v114_v14 = vld [vmem:[%s207_s0 + $0x2] sm:$0x1]  }
   0x8   :  { %s143_s19 = smov 24   ;;  %s144_s20 = smov 16   ;;  %v115_v15 = vld [vmem:[%s207_s0 + $0x1] sm:$0x1]   ;;  %vm27_vm4 = vcmask 851712   ;;  %vm33_vm5 = vcmask 786112  }
   0x9   :  { %s145_s0 = smov 8   ;;  %vm39_vm6 = vcmask 720512   ;;  %vm45_vm7 = vcmask 654912   ;;  %vm51_vm8 = vcmask 589312   ;;  %vm57_vm9 = vcmask 523712  }
   0xa   :  { %31 = vrot.lane.b32.xlu0 %v105_v4, %s135_s24  ;;  %37 = vrot.lane.b32.xlu1 %v106_v5, %s136_s25  ;;  %vm63_vm10 = vcmask 458112   ;;  %vm69_vm11 = vcmask 392512   ;;  %vm75_vm12 = vcmask 326912   ;;  %vm81_vm13 = vcmask 261312  }
   0xb   :  { %vm87_vm14 = vcmask 195712   ;;  %vm93_vm15 = vcmask 130112  }
   0xe   :  { %43 = vrot.lane.b32.xlu0 %v107_v7, %s137_s30  ;;  %49 = vrot.lane.b32.xlu1 %v108_v8, %s138_s2 }
  0x12   :  { %55 = vrot.lane.b32.xlu0 %v109_v9, %s139_s7  ;;  %61 = vrot.lane.b32.xlu1 %v110_v10, %s140_s8 }
  0x16   :  { %67 = vrot.lane.b32.xlu0 %v111_v11, %s141_s13  ;;  %73 = vrot.lane.b32.xlu1 %v112_v12, %s142_s14 }
  0x1a   :  { %79 = vrot.lane.b32.xlu0 %v113_v13, %s143_s19  ;;  %85 = vrot.lane.b32.xlu1 %v114_v14, %s144_s20 }
  0x1e   :  { %91 = vrot.lane.b32.xlu0 %v115_v15, %s145_s0 }
  0x74   :  { %v8_v16 = vpop.permute.xlu0 %7   ;;  %v20_v17 = vpop.permute.xlu1 %19  }
  0x75   :  { %10 = vst.msk [vmem:[#allocation0] sm:$0x1] %vm9_vm1, %v8_v16  }
  0x78   :  { %v14_v18 = vpop.permute.xlu0 %13   ;;  %v26_v19 = vpop.permute.xlu1 %25  }
  0x79   :  { %16 = vst.msk [vmem:[#allocation0] sm:$0x1] %vm15_vm2, %v14_v18  }
  0x7a   :  { %22 = vst.msk [vmem:[#allocation0] sm:$0x1] %vm21_vm3, %v20_v17  }
  0x7b   :  { %28 = vst.msk [vmem:[#allocation0] sm:$0x1] %vm27_vm4, %v26_v19  }
  0x7c   :  { %v32_v20 = vpop.permute.xlu0 %31   ;;  %v38_v21 = vpop.permute.xlu1 %37  }
  0x7d   :  { %34 = vst.msk [vmem:[#allocation0] sm:$0x1] %vm33_vm5, %v32_v20  }
  0x7e   :  { %40 = vst.msk [vmem:[#allocation0] sm:$0x1] %vm39_vm6, %v38_v21  }
  0x80   :  { %v44_v22 = vpop.permute.xlu0 %43   ;;  %v50_v23 = vpop.permute.xlu1 %49  }
  0x81   :  { %46 = vst.msk [vmem:[#allocation0] sm:$0x1] %vm45_vm7, %v44_v22  }
  0x82   :  { %52 = vst.msk [vmem:[#allocation0] sm:$0x1] %vm51_vm8, %v50_v23  }
  0x84   :  { %v56_v24 = vpop.permute.xlu0 %55   ;;  %v62_v25 = vpop.permute.xlu1 %61  }
  0x85   :  { %58 = vst.msk [vmem:[#allocation0] sm:$0x1] %vm57_vm9, %v56_v24  }
  0x86   :  { %64 = vst.msk [vmem:[#allocation0] sm:$0x1] %vm63_vm10, %v62_v25  }
  0x88   :  { %v68_v26 = vpop.permute.xlu0 %67   ;;  %v74_v27 = vpop.permute.xlu1 %73  }
  0x89   :  { %70 = vst.msk [vmem:[#allocation0] sm:$0x1] %vm69_vm11, %v68_v26  }
  0x8a   :  { %76 = vst.msk [vmem:[#allocation0] sm:$0x1] %vm75_vm12, %v74_v27  }
  0x8c   :  { %v80_v28 = vpop.permute.xlu0 %79   ;;  %v86_v29 = vpop.permute.xlu1 %85  }
  0x8d   :  { %82 = vst.msk [vmem:[#allocation0] sm:$0x1] %vm81_vm13, %v80_v28  }
  0x8e   :  { %88 = vst.msk [vmem:[#allocation0] sm:$0x1] %vm87_vm14, %v86_v29  }
  0x90   :  { %v92_v30 = vpop.permute.xlu0 %91  }
  0x91   :  { %94 = vst.msk [vmem:[#allocation0] sm:$0x1] %vm93_vm15, %v92_v30  }
  0x98   :  { %v98_v31 = vld [vmem:[#allocation0] sm:$0x1] }
  0x99   :  { %100 = vst [vmem:[%s208_s1] sm:$0x1] %v98_v31 }

// kernel: tile.38
= control target key start
LH: loop header
LB: loop body
LE: loop exit
PB: predicated region body
PF: predicated region fallthrough
CT: control target
= control target key end

     0   :  { %s28_s0 = inlined_call_operand.vmem [shape: f32[4], index: 0, kind: input, shape index: {}]   ;;  %s29_s1 = inlined_call_operand.vmem [shape: f32[16,4], index: 1, kind: output, shape index: {}]  }
   0x1   :  { %v4_v0 = vld [vmem:[%s28_s0] ss:$0 sm:$0xff] }
   0x2   :  { %5 = vst [vmem:[%s29_s1] sm:$0xff] %v4_v0  ;;  %8 = vst [vmem:[%s29_s1 + $0x8] sm:$0xff] %v4_v0 }

// kernel: tile.39
= control target key start
LH: loop header
LB: loop body
LE: loop exit
PB: predicated region body
PF: predicated region fallthrough
CT: control target
= control target key end

     0   :  { %s131_s10 = smov 60   ;;  %s132_s11 = smov 52   ;;  %vm3_vm0 = vcmask 31744   ;;  %vm9_vm1 = vcmask 523744   ;;  %vm15_vm2 = vcmask 490944   ;;  %vm21_vm3 = vcmask 458144   ;;  %s207_s0 = inlined_call_operand.vmem [shape: f32[16,4], index: 0, kind: input, shape index: {}]   ;;  %s208_s1 = inlined_call_operand.vmem [shape: f32[1,64], index: 1, kind: output, shape index: {}]  }
   0x1   :  { %v101_v0 = vld [vmem:[%s207_s0 + $0xf] sm:$0x1]   ;;  %v103_v1 = vld [vmem:[%s207_s0 + $0xd] sm:$0x1]   ;;  %v102_v2 = vld [vmem:[%s207_s0 + $0xe] sm:$0x1]  }
   0x2   :  { %7 = vrot.lane.b32.xlu0 %v101_v0, %s131_s10  ;;  %19 = vrot.lane.b32.xlu1 %v103_v1, %s132_s11  ;;  %v104_v3 = vld [vmem:[%s207_s0 + $0xc] sm:$0x1]   ;;  %s133_s16 = smov 56   ;;  %s134_s17 = smov 48   ;;  %v105_v4 = vld [vmem:[%s207_s0 + $0xb] sm:$0x1]  }
   0x3   :  { %v106_v5 = vld [vmem:[%s207_s0 + $0xa] sm:$0x1]   ;;  %v2_v6 = vld [vmem:[%s207_s0] sm:$0x1]   ;;  %s135_s24 = smov 44   ;;  %s136_s25 = smov 40  }
   0x4   :  { %4 = vst.msk [vmem:[#allocation0] sm:$0x1] %vm3_vm0, %v2_v6   ;;  %v107_v7 = vld [vmem:[%s207_s0 + $0x9] sm:$0x1]   ;;  %v108_v8 = vld [vmem:[%s207_s0 + $0x8] sm:$0x1]  }
   0x5   :  { %s137_s30 = smov 36   ;;  %s138_s2 = smov 32   ;;  %v109_v9 = vld [vmem:[%s207_s0 + $0x7] sm:$0x1]   ;;  %v110_v10 = vld [vmem:[%s207_s0 + $0x6] sm:$0x1]  }
   0x6   :  { %13 = vrot.lane.b32.xlu0 %v102_v2, %s133_s16  ;;  %25 = vrot.lane.b32.xlu1 %v104_v3, %s134_s17  ;;  %s139_s7 = smov 28   ;;  %s140_s8 = smov 24   ;;  %v111_v11 = vld [vmem:[%s207_s0 + $0x5] sm:$0x1]   ;;  %v112_v12 = vld [vmem:[%s207_s0 + $0x4] sm:$0x1]  }
   0x7   :  { %s141_s13 = smov 20   ;;  %s142_s14 = smov 16   ;;  %v113_v13 = vld [vmem:[%s207_s0 + $0x3] sm:$0x1]   ;;  %v114_v14 = vld [vmem:[%s207_s0 + $0x2] sm:$0x1]  }
   0x8   :  { %s143_s19 = smov 12   ;;  %s144_s20 = smov 8   ;;  %v115_v15 = vld [vmem:[%s207_s0 + $0x1] sm:$0x1]   ;;  %vm27_vm4 = vcmask 425344   ;;  %vm33_vm5 = vcmask 392544  }
   0x9   :  { %s145_s0 = smov 4   ;;  %vm39_vm6 = vcmask 359744   ;;  %vm45_vm7 = vcmask 326944   ;;  %vm51_vm8 = vcmask 294144   ;;  %vm57_vm9 = vcmask 261344  }
   0xa   :  { %31 = vrot.lane.b32.xlu0 %v105_v4, %s135_s24  ;;  %37 = vrot.lane.b32.xlu1 %v106_v5, %s136_s25  ;;  %vm63_vm10 = vcmask 228544   ;;  %vm69_vm11 = vcmask 195744   ;;  %vm75_vm12 = vcmask 162944   ;;  %vm81_vm13 = vcmask 130144  }
   0xb   :  { %vm87_vm14 = vcmask 97344   ;;  %vm93_vm15 = vcmask 64544  }
   0xe   :  { %43 = vrot.lane.b32.xlu0 %v107_v7, %s137_s30  ;;  %49 = vrot.lane.b32.xlu1 %v108_v8, %s138_s2 }
  0x12   :  { %55 = vrot.lane.b32.xlu0 %v109_v9, %s139_s7  ;;  %61 = vrot.lane.b32.xlu1 %v110_v10, %s140_s8 }
  0x16   :  { %67 = vrot.lane.b32.xlu0 %v111_v11, %s141_s13  ;;  %73 = vrot.lane.b32.xlu1 %v112_v12, %s142_s14 }
  0x1a   :  { %79 = vrot.lane.b32.xlu0 %v113_v13, %s143_s19  ;;  %85 = vrot.lane.b32.xlu1 %v114_v14, %s144_s20 }
  0x1e   :  { %91 = vrot.lane.b32.xlu0 %v115_v15, %s145_s0 }
  0x74   :  { %v8_v16 = vpop.permute.xlu0 %7   ;;  %v20_v17 = vpop.permute.xlu1 %19  }
  0x75   :  { %10 = vst.msk [vmem:[#allocation0] sm:$0x1] %vm9_vm1, %v8_v16  }
  0x78   :  { %v14_v18 = vpop.permute.xlu0 %13   ;;  %v26_v19 = vpop.permute.xlu1 %25  }
  0x79   :  { %16 = vst.msk [vmem:[#allocation0] sm:$0x1] %vm15_vm2, %v14_v18  }
  0x7a   :  { %22 = vst.msk [vmem:[#allocation0] sm:$0x1] %vm21_vm3, %v20_v17  }
  0x7b   :  { %28 = vst.msk [vmem:[#allocation0] sm:$0x1] %vm27_vm4, %v26_v19  }
  0x7c   :  { %v32_v20 = vpop.permute.xlu0 %31   ;;  %v38_v21 = vpop.permute.xlu1 %37  }
  0x7d   :  { %34 = vst.msk [vmem:[#allocation0] sm:$0x1] %vm33_vm5, %v32_v20  }
  0x7e   :  { %40 = vst.msk [vmem:[#allocation0] sm:$0x1] %vm39_vm6, %v38_v21  }
  0x80   :  { %v44_v22 = vpop.permute.xlu0 %43   ;;  %v50_v23 = vpop.permute.xlu1 %49  }
  0x81   :  { %46 = vst.msk [vmem:[#allocation0] sm:$0x1] %vm45_vm7, %v44_v22  }
  0x82   :  { %52 = vst.msk [vmem:[#allocation0] sm:$0x1] %vm51_vm8, %v50_v23  }
  0x84   :  { %v56_v24 = vpop.permute.xlu0 %55   ;;  %v62_v25 = vpop.permute.xlu1 %61  }
  0x85   :  { %58 = vst.msk [vmem:[#allocation0] sm:$0x1] %vm57_vm9, %v56_v24  }
  0x86   :  { %64 = vst.msk [vmem:[#allocation0] sm:$0x1] %vm63_vm10, %v62_v25  }
  0x88   :  { %v68_v26 = vpop.permute.xlu0 %67   ;;  %v74_v27 = vpop.permute.xlu1 %73  }
  0x89   :  { %70 = vst.msk [vmem:[#allocation0] sm:$0x1] %vm69_vm11, %v68_v26  }
  0x8a   :  { %76 = vst.msk [vmem:[#allocation0] sm:$0x1] %vm75_vm12, %v74_v27  }
  0x8c   :  { %v80_v28 = vpop.permute.xlu0 %79   ;;  %v86_v29 = vpop.permute.xlu1 %85  }
  0x8d   :  { %82 = vst.msk [vmem:[#allocation0] sm:$0x1] %vm81_vm13, %v80_v28  }
  0x8e   :  { %88 = vst.msk [vmem:[#allocation0] sm:$0x1] %vm87_vm14, %v86_v29  }
  0x90   :  { %v92_v30 = vpop.permute.xlu0 %91  }
  0x91   :  { %94 = vst.msk [vmem:[#allocation0] sm:$0x1] %vm93_vm15, %v92_v30  }
  0x98   :  { %v98_v31 = vld [vmem:[#allocation0] sm:$0x1] }
  0x99   :  { %100 = vst [vmem:[%s208_s1] sm:$0x1] %v98_v31 }

// kernel: inception_forward.1
= control target key start
LH: loop header
LB: loop body
LE: loop exit
PB: predicated region body
PF: predicated region fallthrough
CT: control target
= control target key end

     0   :  { %s2564_s13 = smov 0   ;;  %s3104_s0 = inlined_call_operand.vmem [shape: f32[2,16,64], index: 0, kind: input, shape index: {}]   ;;  %s3105_s1 = inlined_call_operand.vmem [shape: f32[64,256], index: 1, kind: input, shape index: {}]   ;;  %s3106_s2 = inlined_call_operand.vmem [shape: f32[1,256], index: 2, kind: input, shape index: {}]   ;;  %s3107_s3 = inlined_call_operand.vmem [shape: f32[3,128,128], index: 3, kind: input, shape index: {}]   ;;  %s3108_s4 = inlined_call_operand.vmem [shape: f32[5,128,128], index: 4, kind: input, shape index: {}]   ;;  %s3109_s5 = inlined_call_operand.vmem [shape: f32[64,128], index: 5, kind: input, shape index: {}]   ;;  %s3110_s6 = inlined_call_operand.vmem [shape: f32[1,384], index: 6, kind: input, shape index: {}]   ;;  %s3111_s7 = inlined_call_operand.vmem [shape: f32[2,16,128], index: 7, kind: output, shape index: {0}]   ;;  %s3112_s8 = inlined_call_operand.vmem [shape: f32[2,16,128], index: 8, kind: output, shape index: {1}]   ;;  %s3113_s9 = inlined_call_operand.vmem [shape: f32[2,16,128], index: 9, kind: output, shape index: {2}]   ;;  %s3114_s10 = inlined_call_operand.vmem [shape: f32[2,16,128], index: 10, kind: output, shape index: {3}]  }
   0x1 LB: > { %s1605_s14 = sadd.s32 4294967295, %s2502_s13   ;;  %p1609_p0 = scmp.ge.s32.totalorder %s2502_s13, 1  ;;  %s2502_s13 = sphi %s2564_s13, %s21_s13  }
   0x2   : > { %p319_p1 = scmp.lt.s32.totalorder %s2502_s13, 3 }
   0x4   : > { %p320_p2 = pnand %p1609_p0, %p319_p1 }
   0x5   : > { %v400_v0 = vld [vmem:[%s3105_s1 + $0x8] sm:$0xff] (!%p320_p2)  ;;  %v402_v1 = vld [vmem:[%s3105_s1 + $0x18] sm:$0xff] (!%p320_p2)  ;;  %v399_v2 = vld [vmem:[%s3105_s1] sm:$0xff] (!%p320_p2)  ;;  %p372_p3 = scmp.lt.s32.totalorder (!%p320_p2), %s1605_s14, 1  ;;  %v2504_v7 = vmov (!%p320_p2), 0.0   ;;  %vm1305_vm0 = vcmask (!%p320_p2), 581632  }
   0x6   : > { %323 = sbr.rel (%p320_p2) target bundleno = 576 (0x240), region = 48  ;;  %v2183_v3 = vpack.c.bf16 (!%p320_p2), %v402_v1, %v400_v0  ;;  %v401_v4 = vld [vmem:[%s3105_s1 + $0x10] sm:$0xff] (!%p320_p2)  ;;  %v404_v5 = vld [vmem:[%s3105_s1 + $0x28] sm:$0xff] (!%p320_p2)  ;;  %v406_v6 = vld [vmem:[%s3105_s1 + $0x38] sm:$0xff] (!%p320_p2)  ;;  %498 = vmatprep.mubr.f32.mxu0 (!%p320_p2), %v2504_v7  ;;  %517 = vst [vmem:[#allocation2] sm:$0xff] (!%p320_p2), %v2504_v7  ;;  %v2505_v13 = vmov (!%p320_p2), -inf  }
   0x7   : > { %518 = vst [vmem:[#allocation2 + $0x18] sm:$0xff] (!%p320_p2), %v2504_v7  ;;  %v2185_v8 = vpack.c.bf16 (!%p320_p2), %v401_v4, %v399_v2  ;;  %v2187_v9 = vpack.c.bf16 (!%p320_p2), %v406_v6, %v404_v5  ;;  %v403_v10 = vld [vmem:[%s3105_s1 + $0x20] sm:$0xff] (!%p320_p2)  ;;  %v405_v11 = vld [vmem:[%s3105_s1 + $0x30] sm:$0xff] (!%p320_p2)  ;;  %v408_v12 = vld [vmem:[%s3105_s1 + $0x48] sm:$0xff] (!%p320_p2)  ;;  %vm1308_vm1 = vcmask (!%p320_p2), 31744   ;;  %vm1311_vm2 = vcmask (!%p320_p2), 589344  }
   0x8   : > { %1306 = vst.msk [vmem:[#allocation3 + $0x7] sm:$0x1] (!%p320_p2), %vm1305_vm0, %v2505_v13  ;;  %1307 = vst.msk [vmem:[#allocation3 + $0x18] sm:$0x1] (!%p320_p2), %vm1305_vm0, %v2505_v13  ;;  %2184 = vmatprep.subr.bf16.mxu0 (!%p320_p2), %v2183_v3  ;;  %v410_v14 = vld [vmem:[%s3105_s1 + $0x58] sm:$0xff] (!%p320_p2)  ;;  %v2189_v15 = vpack.c.bf16 (!%p320_p2), %v405_v11, %v403_v10  ;;  %v407_v17 = vld [vmem:[%s3105_s1 + $0x40] sm:$0xff] (!%p320_p2) }
   0x9   : > { %1309 = vst.msk [vmem:[#allocation3 + $0x8] sm:$0xff] (!%p320_p2), %vm1308_vm1, %v2505_v13  ;;  %1310 = vst.msk [vmem:[#allocation3 + $0x10] sm:$0xff] (!%p320_p2), %vm1308_vm1, %v2505_v13  ;;  %2186 = vmatpush1.bf16.msra.mxu0 (!%p320_p2), %v2185_v8  ;;  %v2191_v16 = vpack.c.bf16 (!%p320_p2), %v410_v14, %v408_v12  ;;  %v409_v18 = vld [vmem:[%s3105_s1 + $0x50] sm:$0xff] (!%p320_p2)  ;;  %v412_v20 = vld [vmem:[%s3105_s1 + $0x68] sm:$0xff] (!%p320_p2)  ;;  %s2506_s28 = smov (!%p320_p2), 4   ;;  %vm427_vm3 = vcmask (!%p320_p2), 523264  }
   0xa   : > { %1312 = vst.msk [vmem:[#allocation3 + $0x8] sm:$0xff] (!%p320_p2), %vm1311_vm2, %v2505_v13  ;;  %1313 = vst.msk [vmem:[#allocation3 + $0x10] sm:$0xff] (!%p320_p2), %vm1311_vm2, %v2505_v13  ;;  %2188 = vmatprep.subr.bf16.mxu0 (!%p320_p2), %v2187_v9  ;;  %v414_v21 = vld [vmem:[%s3105_s1 + $0x78] sm:$0xff] (!%p320_p2)  ;;  %v2193_v23 = vpack.c.bf16 (!%p320_p2), %v409_v18, %v407_v17  ;;  %v411_v25 = vld [vmem:[%s3105_s1 + $0x60] sm:$0xff] (!%p320_p2)  ;;  %vm1320_vm4 = vcmask (!%p320_p2), 556064   ;;  %s2507_s15 = smov (!%p320_p2), 124  }
   0xb   : > { %v2195_v24 = vpack.c.bf16 (!%p320_p2), %v414_v21, %v412_v20  ;;  %v413_v26 = vld [vmem:[%s3105_s1 + $0x70] sm:$0xff] (!%p320_p2)  ;;  %v1622_v28 = vld [vmem:[%s3107_s3 + $0x80] sm:$0xff] (!%p320_p2)  ;;  %v1623_v29 = vld [vmem:[%s3107_s3 + $0x88] sm:$0xff] (!%p320_p2)  ;;  %s2508_s16 = smov (!%p320_p2), 120  }
   0xc   : > { %v2197_v27 = vpack.c.bf16 (!%p320_p2), %v413_v26, %v411_v25  ;;  %v819_v30 = vld [vmem:[%s3108_s4] sm:$0xff] (!%p320_p2)  ;;  %v2199_v31 = vpack.c.bf16 (!%p320_p2), %v1623_v29, %v1622_v28  ;;  %v820_v32 = vld [vmem:[%s3108_s4 + $0x8] sm:$0xff] (!%p320_p2)  ;;  %v1624_v33 = vld [vmem:[%s3107_s3 + $0x90] sm:$0xff] (!%p320_p2) }
   0xd   : > { %s3116_s14 = smov (!%p372_p3, %s1605_s14), 1  ;;  %2190 = vmatpush1.bf16.msra.mxu0 %v2189_v15  ;;  %v1625_v34 = vld [vmem:[%s3107_s3 + $0x98] sm:$0xff]  ;;  %v2327_v35 = vpack.c.bf16 %v820_v32, %v819_v30  ;;  %v821_v37 = vld [vmem:[%s3108_s4 + $0x10] sm:$0xff]  ;;  %v1626_v39 = vld [vmem:[%s3107_s3 + $0xa0] sm:$0xff]  ;;  %v417_v30 = vlaneseq }
   0xe   : > { %s2605_s17 = sshll.u32 %s3116_s14, 4  ;;  %2192 = vmatprep.subr.bf16.mxu0 %v2191_v16  ;;  %v2203_v36 = vpack.c.bf16 %v1625_v34, %v1624_v33  ;;  %v822_v38 = vld [vmem:[%s3108_s4 + $0x18] sm:$0xff]  ;;  %2200 = vmatprep.subr.bf16.mxu1 %v2199_v31  ;;  %v1627_v41 = vld [vmem:[%s3107_s3 + $0xa8] sm:$0xff]  ;;  %v823_v42 = vld [vmem:[%s3108_s4 + $0x20] sm:$0xff] }
   0xf   : > { %s376_s20 = scalar_lea.vmem %s3104_s0, %s2605_s17  ;;  %v2331_v40 = vpack.c.bf16 %v822_v38, %v821_v37  ;;  %v824_v43 = vld [vmem:[%s3108_s4 + $0x28] sm:$0xff]  ;;  %2202 = vmatpush3.bf16.msra.mxu1 %v2199_v31  ;;  %v2207_v44 = vpack.c.bf16 %v1627_v41, %v1626_v39  ;;  %v1628_v46 = vld [vmem:[%s3107_s3 + $0xb0] sm:$0xff]  ;;  %v1629_v47 = vld [vmem:[%s3107_s3 + $0xb8] sm:$0xff]  ;;  %v418_v31 = vshrl.u32 %v417_v30, 7  ;;  %s381_s22 = scalar_lea.vmem %s3111_s7, %s2605_s17 }
  0x10   : > { %v397_v19 = vld [vmem:[%s376_s20] sm:$0xff]  ;;  %v398_v22 = vld [vmem:[%s376_s20 + $0x8] sm:$0xff]  ;;  %2204 = vmatprep.subr.bf16.mxu1 %v2203_v36  ;;  %v2335_v45 = vpack.c.bf16 %v824_v43, %v823_v42  ;;  %v825_v48 = vld [vmem:[%s3108_s4 + $0x30] sm:$0xff]  ;;  %v2211_v50 = vpack.c.bf16 %v1629_v47, %v1628_v46  ;;  %s396_s21 = scalar_lea.vmem %s3114_s10, %s2605_s17 }
  0x11   : > { %1314 = vrot.lane.b32.xlu0 %v397_v19, %s2506_s28  ;;  %2194 = vmatpush1.bf16.msra.mxu0 %v2193_v23  ;;  %v826_v49 = vld [vmem:[%s3108_s4 + $0x38] sm:$0xff]  ;;  %v1630_v52 = vld [vmem:[%s3107_s3 + $0xc0] sm:$0xff]  ;;  %v1631_v53 = vld [vmem:[%s3107_s3 + $0xc8] sm:$0xff]  ;;  %v419_v32 = vsub.s32 0, %v418_v31  ;;  %v423_v34 = vsub.s32 1, %v418_v31 }
  0x12   : > { %2196 = vmatprep.subr.bf16.mxu0 %v2195_v24  ;;  %v2339_v51 = vpack.c.bf16 %v826_v49, %v825_v48  ;;  %v2215_v54 = vpack.c.bf16 %v1631_v53, %v1630_v52  ;;  %v1632_v55 = vld [vmem:[%s3107_s3 + $0xd0] sm:$0xff]  ;;  %v1633_v56 = vld [vmem:[%s3107_s3 + $0xd8] sm:$0xff]  ;;  %v827_v58 = vld [vmem:[%s3108_s4 + $0x40] sm:$0xff] }
  0x13   : > { %2206 = vmatpush3.bf16.msra.mxu1 %v2203_v36  ;;  %v2219_v57 = vpack.c.bf16 %v1633_v56, %v1632_v55  ;;  %v828_v59 = vld [vmem:[%s3108_s4 + $0x48] sm:$0xff]  ;;  %v1634_v60 = vld [vmem:[%s3107_s3 + $0xe0] sm:$0xff]  ;;  %v829_v0 = vld [vmem:[%s3108_s4 + $0x50] sm:$0xff] }
  0x14   : > { %2208 = vmatprep.subr.bf16.mxu1 %v2207_v44  ;;  %v2343_v61 = vpack.c.bf16 %v828_v59, %v827_v58  ;;  %v1635_v62 = vld [vmem:[%s3107_s3 + $0xe8] sm:$0xff]  ;;  %v830_v1 = vld [vmem:[%s3108_s4 + $0x58] sm:$0xff]  ;;  %v1636_v2 = vld [vmem:[%s3107_s3 + $0xf0] sm:$0xff] }
  0x15   : > { %1316 = vrot.lane.b32.xlu0 %v398_v22, %s2506_s28  ;;  %2198 = vmatpush1.bf16.msra.mxu0 %v2197_v27  ;;  %v2223_v63 = vpack.c.bf16 %v1635_v62, %v1634_v60  ;;  %v2347_v3 = vpack.c.bf16 %v830_v1, %v829_v0  ;;  %v1637_v4 = vld [vmem:[%s3107_s3 + $0xf8] sm:$0xff]  ;;  %v831_v6 = vld [vmem:[%s3108_s4 + $0x60] sm:$0xff]  ;;  %v524_v10 = vld [vmem:[%s3107_s3 + $0x8] sm:$0xff]  ;;  %s386_s28 = scalar_lea.vmem %s3112_s8, %s2605_s17 }
  0x16   : > { %2328 = vmatprep.subr.bf16.mxu0 %v2327_v35  ;;  %v2227_v5 = vpack.c.bf16 %v1637_v4, %v1636_v2  ;;  %v523_v8 = vld [vmem:[%s3107_s3] sm:$0xff]  ;;  %v833_v12 = vld [vmem:[%s3108_s4 + $0x70] sm:$0xff]  ;;  %v834_v13 = vld [vmem:[%s3108_s4 + $0x78] sm:$0xff] }
  0x17   : > { %2210 = vmatpush3.bf16.msra.mxu1 %v2207_v44  ;;  %v2728_v11 = vpack.c.bf16 %v524_v10, %v523_v8  ;;  %v2355_v14 = vpack.c.bf16 %v834_v13, %v833_v12  ;;  %v1671_v15 = vld [vmem:[%s3108_s4 + $0x100] sm:$0xff]  ;;  %v1672_v16 = vld [vmem:[%s3108_s4 + $0x108] sm:$0xff]  ;;  %v525_v46 = vld [vmem:[%s3107_s3 + $0x10] sm:$0xff] }
  0x18   : > { %1620 = vmatmul.mubr.msk.f32.vlgmr.msra.gmra.mrb[0].mxu0 %vm427_vm3, %v397_v19  ;;  %2212 = vmatprep.subr.bf16.mxu1 %v2211_v50  ;;  %v2743_v17 = vpack.c.bf16 %v1672_v16, %v1671_v15  ;;  %v415_v33 = vld [vmem:[%s3106_s2] sm:$0x3]  ;;  %v526_v47 = vld [vmem:[%s3107_s3 + $0x18] sm:$0xff]  ;;  %v528_v53 = vld [vmem:[%s3107_s3 + $0x28] sm:$0xff] }
  0x19   : > { %504 = vmatprep.mubr.f32.mxu0 %v2504_v7  ;;  %2330 = vmatpush3.bf16.msra.mxu0 %v2327_v35  ;;  %v832_v7 = vld [vmem:[%s3108_s4 + $0x68] sm:$0xff]  ;;  %v420_v35 = vrot.slane %v415_v33, %v419_v32  ;;  %v424_v36 = vrot.slane %v415_v33, %v423_v34  ;;  %v527_v52 = vld [vmem:[%s3107_s3 + $0x20] sm:$0xff]  ;;  %v1674_v58 = vld [vmem:[%s3108_s4 + $0x118] sm:$0xff] }
  0x1a   : > { %2332 = vmatprep.subr.bf16.mxu0 %v2331_v40  ;;  %v2351_v9 = vpack.c.bf16 %v832_v7, %v831_v6  ;;  %v2239_v55 = vpack.c.bf16 %v528_v53, %v527_v52  ;;  %v529_v59 = vld [vmem:[%s3107_s3 + $0x30] sm:$0xff]  ;;  %v530_v60 = vld [vmem:[%s3107_s3 + $0x38] sm:$0xff]  ;;  %v1676_v0 = vld [vmem:[%s3108_s4 + $0x128] sm:$0xff] }
  0x1b   : > { %2214 = vmatpush3.bf16.msra.mxu1 %v2211_v50  ;;  %v2243_v1 = vpack.c.bf16 %v530_v60, %v529_v59  ;;  %v531_v2 = vld [vmem:[%s3107_s3 + $0x40] sm:$0xff]  ;;  %v1678_v6 = vld [vmem:[%s3108_s4 + $0x138] sm:$0xff]  ;;  %v533_v8 = vld [vmem:[%s3107_s3 + $0x50] sm:$0xff] }
  0x1c   : > { %1621 = vmatmul.mubr.msk.f32.gmra.mrb[2].mxu0 %vm427_vm3, %v398_v22  ;;  %2216 = vmatprep.subr.bf16.mxu1 %v2215_v54  ;;  %v1680_v12 = vld [vmem:[%s3108_s4 + $0x148] sm:$0xff]  ;;  %v1685_v31 = vld [vmem:[%s3108_s4 + $0x170] sm:$0xff]  ;;  %v1686_v32 = vld [vmem:[%s3108_s4 + $0x178] sm:$0xff] }
  0x1d   : > { %2334 = vmatpush3.bf16.msra.mxu0 %v2331_v40  ;;  %v536_v15 = vld [vmem:[%s3107_s3 + $0x68] sm:$0xff]  ;;  %v1640_v34 = vld [vmem:[%s3107_s3 + $0x110] sm:$0xff]  ;;  %v1691_v52 = vld [vmem:[%s3108_s4 + $0x1a0] sm:$0xff] }
  0x1e   : > { %2336 = vmatprep.subr.bf16.mxu0 %v2335_v45  ;;  %v1692_v53 = vld [vmem:[%s3108_s4 + $0x1a8] sm:$0xff]  ;;  %v1693_v59 = vld [vmem:[%s3108_s4 + $0x1b0] sm:$0xff] }
  0x1f   : > { %2218 = vmatpush3.bf16.msra.mxu1 %v2215_v54  ;;  %v1673_v54 = vld [vmem:[%s3108_s4 + $0x110] sm:$0xff] }
  0x20   : > { %2220 = vmatprep.subr.bf16.mxu1 %v2219_v57 }
  0x21   : > { %2338 = vmatpush3.bf16.msra.mxu0 %v2335_v45 }
  0x22   : > { %2340 = vmatprep.subr.bf16.mxu0 %v2339_v51 }
  0x23   : > { %2222 = vmatpush3.bf16.msra.mxu1 %v2219_v57 }
  0x24   : > { %2224 = vmatprep.subr.bf16.mxu1 %v2223_v63 }
  0x25   : > { %2342 = vmatpush3.bf16.msra.mxu0 %v2339_v51  ;;  %v2235_v51 = vpack.c.bf16 %v526_v47, %v525_v46  ;;  %v1690_v46 = vld [vmem:[%s3108_s4 + $0x198] sm:$0xff] }
  0x26   : > { %2344 = vmatprep.subr.bf16.mxu0 %v2343_v61 }
  0x27   : > { %2226 = vmatpush3.bf16.msra.mxu1 %v2223_v63  ;;  %v1675_v63 = vld [vmem:[%s3108_s4 + $0x120] sm:$0xff] }
  0x28   : > { %2228 = vmatprep.subr.bf16.mxu1 %v2227_v5  ;;  %v2367_v4 = vpack.c.bf16 %v1676_v0, %v1675_v63  ;;  %v1695_v0 = vld [vmem:[%s3108_s4 + $0x1c0] sm:$0xff] }
  0x29   : > { %2346 = vmatpush3.bf16.msra.mxu0 %v2343_v61  ;;  %v2363_v61 = vpack.c.bf16 %v1674_v58, %v1673_v54  ;;  %v2399_v58 = vpack.c.bf16 %v1692_v53, %v1691_v52  ;;  %v1711_v53 = vld [vmem:[%s3108_s4 + $0x240] sm:$0xff] }
  0x2a   : > { %2348 = vmatprep.subr.bf16.mxu0 %v2347_v3 }
  0x2b   : > { %2230 = vmatpush3.bf16.msra.mxu1 %v2227_v5  ;;  %v1677_v5 = vld [vmem:[%s3108_s4 + $0x130] sm:$0xff] }
  0x2c   : > { %2232 = vmatprep.subr.bf16.mxu1 %v2728_v11  ;;  %v2371_v10 = vpack.c.bf16 %v1678_v6, %v1677_v5  ;;  %v1697_v6 = vld [vmem:[%s3108_s4 + $0x1d0] sm:$0xff] }
  0x2d   : > { %2350 = vmatpush3.bf16.msra.mxu0 %v2347_v3  ;;  %v532_v3 = vld [vmem:[%s3107_s3 + $0x48] sm:$0xff] }
  0x2e   : > { %2352 = vmatprep.subr.bf16.mxu0 %v2351_v9  ;;  %v2247_v7 = vpack.c.bf16 %v532_v3, %v531_v2  ;;  %v1650_v3 = vld [vmem:[%s3107_s3 + $0x160] sm:$0xff] }
  0x31   : > { %2354 = vmatpush3.bf16.msra.mxu0 %v2351_v9  ;;  %v534_v9 = vld [vmem:[%s3107_s3 + $0x58] sm:$0xff] }
  0x32   : > { %2356 = vmatprep.subr.bf16.mxu0 %v2355_v14  ;;  %v2251_v13 = vpack.c.bf16 %v534_v9, %v533_v8  ;;  %v1652_v9 = vld [vmem:[%s3107_s3 + $0x170] sm:$0xff] }
  0x35   : > { %2358 = vmatpush3.bf16.msra.mxu0 %v2355_v14  ;;  %v535_v14 = vld [vmem:[%s3107_s3 + $0x60] sm:$0xff] }
  0x36   : > { %2360 = vmatprep.subr.bf16.mxu0 %v2743_v17 }
  0x83   : > { %v1315_v18 = vpop.permute.xlu0 %1314 }
  0x84   : > { %1321 = vst.msk [vmem:[#allocation3 + $0x8] sm:$0xff] %vm1320_vm4, %v1315_v18  ;;  %v1682_v18 = vld [vmem:[%s3108_s4 + $0x158] sm:$0xff] }
  0x87   : > { %v1317_v19 = vpop.permute.xlu0 %1316 }
  0x88   : > { %1322 = vst.msk [vmem:[#allocation3 + $0x10] sm:$0xff] %vm1320_vm4, %v1317_v19  ;;  %v2255_v19 = vpack.c.bf16 %v536_v15, %v535_v14  ;;  %v1655_v15 = vld [vmem:[%s3108_s4 + $0x80] sm:$0xff] }
  0x8b   : > { %v1323_v20 = vld [vmem:[#allocation3 + $0x7] sm:$0xff] }
  0x8c   : > { %v1325_v21 = vld [vmem:[#allocation3 + $0x8] sm:$0xff] }
  0x8d   : > { %v1327_v22 = vmax.f32 %v1323_v20, %v1325_v21  ;;  %v537_v20 = vld [vmem:[%s3107_s3 + $0x70] sm:$0xff]  ;;  %v538_v21 = vld [vmem:[%s3107_s3 + $0x78] sm:$0xff] }
  0x8f   : > { %v1329_v23 = vld [vmem:[#allocation3 + $0x9] sm:$0xff]  ;;  %v1330_v28 = vld [vmem:[#allocation3 + $0x11] sm:$0xff] }
  0x90   : > { %v1324_v24 = vld [vmem:[#allocation3 + $0xf] sm:$0xff]  ;;  %v2746_v26 = vmax.f32 %v1327_v22, %v1329_v23  ;;  %v1683_v23 = vld [vmem:[%s3108_s4 + $0x160] sm:$0xff] }
  0x91   : > { %v1326_v25 = vld [vmem:[#allocation3 + $0x10] sm:$0xff] }
  0x92   : > { %v1328_v27 = vmax.f32 %v1324_v24, %v1326_v25  ;;  %1335 = vrot.lane.b32.xlu1 %v2746_v26, %s2507_s15  ;;  %1343 = vrot.lane.b32.xlu0 %v2746_v26, %s2508_s16  ;;  %v1684_v24 = vld [vmem:[%s3108_s4 + $0x168] sm:$0xff]  ;;  %v2259_v25 = vpack.c.bf16 %v538_v21, %v537_v20  ;;  %v1657_v21 = vld [vmem:[%s3108_s4 + $0x90] sm:$0xff] }
  0x93   : > { %v2383_v30 = vpack.c.bf16 %v1684_v24, %v1683_v23  ;;  %v1703_v24 = vld [vmem:[%s3108_s4 + $0x200] sm:$0xff] }
  0x94   : > { %v2750_v29 = vmax.f32 %v1328_v27, %v1330_v28  ;;  %v1638_v27 = vld [vmem:[%s3107_s3 + $0x100] sm:$0xff]  ;;  %v1639_v28 = vld [vmem:[%s3107_s3 + $0x108] sm:$0xff] }
  0x95   : > { %v2263_v33 = vpack.c.bf16 %v1639_v28, %v1638_v27 }
  0x96   : > { %1337 = vrot.lane.b32.xlu1 %v2750_v29, %s2507_s15  ;;  %s391_s15 = scalar_lea.vmem %s3113_s9, %s2605_s17 }
  0x9a   : > { %1345 = vrot.lane.b32.xlu1 %v2750_v29, %s2508_s16 }
  0xeb   : > { %v500_v37 = vpop.f32.mrb[0].mxu0 }
  0xec   : > { %v501_v38 = vadd.f32 %v500_v37, %v420_v35  ;;  %v502_v39 = vpop.f32.mrb[1].mxu0  ;;  %v1687_v37 = vld [vmem:[%s3108_s4 + $0x180] sm:$0xff] }
  0xed   : > { %v503_v40 = vadd.f32 %v502_v39, %v424_v36 }
  0xee   : > { %v511_v41 = vmax.f32 %v501_v38, 0.0  ;;  %v1688_v38 = vld [vmem:[%s3108_s4 + $0x188] sm:$0xff] }
  0xef   : > { %v512_v42 = vmax.f32 %v503_v40, 0.0  ;;  %v506_v43 = vpop.f32.mrb[2].mxu0 }
  0xf0   : > { %515 = vst [vmem:[%s381_s22] sm:$0xff] %v511_v41  ;;  %v507_v44 = vadd.f32 %v506_v43, %v420_v35  ;;  %v508_v45 = vpop.f32.mrb[3].mxu0  ;;  %v1641_v35 = vld [vmem:[%s3107_s3 + $0x118] sm:$0xff]  ;;  %v1642_v41 = vld [vmem:[%s3107_s3 + $0x120] sm:$0xff]  ;;  %v2391_v43 = vpack.c.bf16 %v1688_v38, %v1687_v37 }
  0xf1   : > { %519 = vst [vmem:[#allocation2 + $0x8] sm:$0xff] %v512_v42  ;;  %v509_v48 = vadd.f32 %v508_v45, %v424_v36  ;;  %1916 = vmatprep.mubr.f32.mxu1 %v512_v42  ;;  %v2387_v36 = vpack.c.bf16 %v1686_v32, %v1685_v31  ;;  %v2267_v39 = vpack.c.bf16 %v1641_v35, %v1640_v34  ;;  %v1689_v45 = vld [vmem:[%s3108_s4 + $0x190] sm:$0xff]  ;;  %v1660_v31 = vld [vmem:[%s3108_s4 + $0xa8] sm:$0xff]  ;;  %v1706_v34 = vld [vmem:[%s3108_s4 + $0x218] sm:$0xff] }
  0xf2   : > { %v513_v49 = vmax.f32 %v507_v44, 0.0  ;;  %v1662_v37 = vld [vmem:[%s3108_s4 + $0xb8] sm:$0xff]  ;;  %v1707_v38 = vld [vmem:[%s3108_s4 + $0x220] sm:$0xff] }
  0xf3   : > { %v2767_v50 = vmax.f32 %v509_v48, 0.0  ;;  %v1644_v48 = vld [vmem:[%s3107_s3 + $0x130] sm:$0xff] }
  0xf4   : > { %516 = vst [vmem:[%s381_s22 + $0x8] sm:$0xff] %v513_v49  ;;  %v1645_v49 = vld [vmem:[%s3107_s3 + $0x138] sm:$0xff] }
  0xf5   : > { %520 = vst [vmem:[#allocation2 + $0x10] sm:$0xff] %v2767_v50  ;;  %1917 = vmatmul.mubr.f32.vlgmr.msra.gmra.mrb[0].mxu1 %v2767_v50  ;;  %v2275_v54 = vpack.c.bf16 %v1645_v49, %v1644_v48  ;;  %v1665_v49 = vld [vmem:[%s3108_s4 + $0xd0] sm:$0xff] }
  0xf6   : > { %2234 = vmatpush3.bf16.msra.mxu1 %v2728_v11  ;;  %v1679_v11 = vld [vmem:[%s3108_s4 + $0x140] sm:$0xff] }
  0xf7   : > { %2236 = vmatprep.subr.bf16.mxu1 %v2235_v51  ;;  %v2375_v16 = vpack.c.bf16 %v1680_v12, %v1679_v11  ;;  %v1699_v12 = vld [vmem:[%s3108_s4 + $0x1e0] sm:$0xff] }
  0xf8   : > { %v817_v56 = vld [vmem:[#allocation2 + $0x6] sm:$0xff] }
  0xf9   : > { %v2781_v57 = vld [vmem:[#allocation2 + $0x7] sm:$0xff]  ;;  %2056 = vmatprep.mubr.f32.mxu0 %v817_v56 }
  0xfa   : > { %1951 = vmatprep.mubr.f32.mxu1 %v2781_v57  ;;  %2238 = vmatpush3.bf16.msra.mxu1 %v2235_v51  ;;  %v2395_v51 = vpack.c.bf16 %v1690_v46, %v1689_v45  ;;  %v1647_v56 = vld [vmem:[%s3107_s3 + $0x148] sm:$0xff]  ;;  %v1709_v46 = vld [vmem:[%s3108_s4 + $0x230] sm:$0xff] }
  0xfb   : > { %2240 = vmatprep.subr.bf16.mxu1 %v2239_v55 }
  0xfc   : > { %v818_v62 = vld [vmem:[#allocation2 + $0xe] sm:$0xff] }
  0xfd   : > { %2057 = vmatmul.mubr.f32.vlgmr.msra.gmra.mrb[4].mxu0 %v818_v62  ;;  %v2872_v40 = vld [vmem:[#allocation2 + $0xf] sm:$0xff]  ;;  %v1649_v62 = vld [vmem:[%s3107_s3 + $0x158] sm:$0xff] }
  0xfe   : > { %2362 = vmatpush3.bf16.msra.mxu0 %v2743_v17  ;;  %2091 = vmatprep.mubr.f32.mxu0 %v512_v42  ;;  %v1681_v17 = vld [vmem:[%s3108_s4 + $0x150] sm:$0xff]  ;;  %v1643_v42 = vld [vmem:[%s3107_s3 + $0x128] sm:$0xff] }
  0xff   : > { %2364 = vmatprep.subr.bf16.mxu0 %v2363_v61  ;;  %2242 = vmatpush3.bf16.msra.mxu1 %v2239_v55  ;;  %v2379_v22 = vpack.c.bf16 %v1682_v18, %v1681_v17  ;;  %v708_v44 = vld [vmem:[#allocation2 + $0x9] sm:$0xff]  ;;  %v2271_v47 = vpack.c.bf16 %v1643_v42, %v1642_v41  ;;  %v1646_v55 = vld [vmem:[%s3107_s3 + $0x140] sm:$0xff]  ;;  %v709_v28 = vld [vmem:[#allocation2 + $0x11] sm:$0xff] }
 0x100   : > { %2244 = vmatprep.subr.bf16.mxu1 %v2243_v1  ;;  %v2279_v60 = vpack.c.bf16 %v1647_v56, %v1646_v55  ;;  %v1701_v18 = vld [vmem:[%s3108_s4 + $0x1f0] sm:$0xff]  ;;  %v1667_v56 = vld [vmem:[%s3108_s4 + $0xe0] sm:$0xff] }
 0x101   : > { %v1196_v42 = vld [vmem:[#allocation2 + $0xa] sm:$0xff] }
 0x102   : > { %2366 = vmatpush3.bf16.msra.mxu0 %v2363_v61  ;;  %v1648_v61 = vld [vmem:[%s3107_s3 + $0x150] sm:$0xff] }
 0x103   : > { %2368 = vmatprep.subr.bf16.mxu0 %v2367_v4  ;;  %2246 = vmatpush3.bf16.msra.mxu1 %v2243_v1  ;;  %v1696_v1 = vld [vmem:[%s3108_s4 + $0x1c8] sm:$0xff]  ;;  %v2283_v2 = vpack.c.bf16 %v1649_v62, %v1648_v61  ;;  %v1669_v62 = vld [vmem:[%s3108_s4 + $0xf0] sm:$0xff] }
 0x104   : > { %2248 = vmatprep.subr.bf16.mxu1 %v2247_v7  ;;  %v2407_v5 = vpack.c.bf16 %v1696_v1, %v1695_v0  ;;  %v1715_v1 = vld [vmem:[%s3108_s4 + $0x260] sm:$0xff] }
 0x106   : > { %2370 = vmatpush3.bf16.msra.mxu0 %v2367_v4  ;;  %v1651_v4 = vld [vmem:[%s3107_s3 + $0x168] sm:$0xff] }
 0x107   : > { %2372 = vmatprep.subr.bf16.mxu0 %v2371_v10  ;;  %2250 = vmatpush3.bf16.msra.mxu1 %v2247_v7  ;;  %v1698_v7 = vld [vmem:[%s3108_s4 + $0x1d8] sm:$0xff]  ;;  %v2287_v8 = vpack.c.bf16 %v1651_v4, %v1650_v3  ;;  %v1351_v4 = vld [vmem:[%s3109_s5] sm:$0xff] }
 0x108   : > { %2252 = vmatprep.subr.bf16.mxu1 %v2251_v13  ;;  %v2411_v11 = vpack.c.bf16 %v1698_v7, %v1697_v6  ;;  %v1336_v6 = vpop.permute.xlu1 %1335 }
 0x10a   : > { %2374 = vmatpush3.bf16.msra.mxu0 %v2371_v10  ;;  %v1653_v10 = vld [vmem:[%s3107_s3 + $0x178] sm:$0xff] }
 0x10b   : > { %2376 = vmatprep.subr.bf16.mxu0 %v2375_v16  ;;  %2254 = vmatpush3.bf16.msra.mxu1 %v2251_v13  ;;  %v1700_v13 = vld [vmem:[%s3108_s4 + $0x1e8] sm:$0xff]  ;;  %v2291_v14 = vpack.c.bf16 %v1653_v10, %v1652_v9  ;;  %v1718_v9 = vld [vmem:[%s3108_s4 + $0x278] sm:$0xff] }
 0x10c   : > { %2256 = vmatprep.subr.bf16.mxu1 %v2255_v19  ;;  %v2415_v17 = vpack.c.bf16 %v1700_v13, %v1699_v12  ;;  %v1354_v12 = vld [vmem:[%s3109_s5 + $0x18] sm:$0xff]  ;;  %v1341_v13 = vmax.f32 %v2746_v26, %v1336_v6 }
 0x10e   : > { %2378 = vmatpush3.bf16.msra.mxu0 %v2375_v16  ;;  %v1656_v16 = vld [vmem:[%s3108_s4 + $0x88] sm:$0xff] }
 0x10f   : > { %2380 = vmatprep.subr.bf16.mxu0 %v2379_v22  ;;  %2258 = vmatpush3.bf16.msra.mxu1 %v2255_v19  ;;  %v1702_v19 = vld [vmem:[%s3108_s4 + $0x1f8] sm:$0xff]  ;;  %v2295_v20 = vpack.c.bf16 %v1656_v16, %v1655_v15 }
 0x110   : > { %2260 = vmatprep.subr.bf16.mxu1 %v2259_v25  ;;  %v2419_v23 = vpack.c.bf16 %v1702_v19, %v1701_v18  ;;  %v1356_v18 = vld [vmem:[%s3109_s5 + $0x28] sm:$0xff] }
 0x112   : > { %2382 = vmatpush3.bf16.msra.mxu0 %v2379_v22  ;;  %v1658_v22 = vld [vmem:[%s3108_s4 + $0x98] sm:$0xff] }
 0x113   : > { %2384 = vmatprep.subr.bf16.mxu0 %v2383_v30  ;;  %2262 = vmatpush3.bf16.msra.mxu1 %v2259_v25  ;;  %v1704_v25 = vld [vmem:[%s3108_s4 + $0x208] sm:$0xff]  ;;  %v2299_v27 = vpack.c.bf16 %v1658_v22, %v1657_v21  ;;  %v1358_v21 = vld [vmem:[%s3109_s5 + $0x38] sm:$0xff]  ;;  %v1338_v22 = vpop.permute.xlu1 %1337 }
 0x114   : > { %2264 = vmatprep.subr.bf16.mxu1 %v2263_v33  ;;  %v2423_v32 = vpack.c.bf16 %v1704_v25, %v1703_v24  ;;  %v1342_v25 = vmax.f32 %v2750_v29, %v1338_v22 }
 0x116   : > { %2386 = vmatpush3.bf16.msra.mxu0 %v2383_v30  ;;  %1952 = vmatmul.mubr.f32.vlgmr.msra.gmra.mrb[0].mxu1 %v2872_v40  ;;  %v1659_v30 = vld [vmem:[%s3108_s4 + $0xa0] sm:$0xff] }
 0x117   : > { %2388 = vmatprep.subr.bf16.mxu0 %v2387_v36  ;;  %2266 = vmatpush3.bf16.msra.mxu1 %v2263_v33  ;;  %v1705_v33 = vld [vmem:[%s3108_s4 + $0x210] sm:$0xff]  ;;  %v2303_v35 = vpack.c.bf16 %v1660_v31, %v1659_v30  ;;  %v1346_v24 = vpop.permute.xlu1 %1345 }
 0x118   : > { %1986 = vmatprep.mubr.f32.mxu1 %v708_v44  ;;  %2268 = vmatprep.subr.bf16.mxu1 %v2267_v39 }
 0x11a   : > { %2390 = vmatpush3.bf16.msra.mxu0 %v2387_v36  ;;  %v1661_v36 = vld [vmem:[%s3108_s4 + $0xb0] sm:$0xff] }
 0x11b   : > { %2392 = vmatprep.subr.bf16.mxu0 %v2391_v43  ;;  %2270 = vmatpush3.bf16.msra.mxu1 %v2267_v39  ;;  %v1708_v39 = vld [vmem:[%s3108_s4 + $0x228] sm:$0xff]  ;;  %v2307_v41 = vpack.c.bf16 %v1662_v37, %v1661_v36 }
 0x11c   : > { %2272 = vmatprep.subr.bf16.mxu1 %v2271_v47  ;;  %v2431_v45 = vpack.c.bf16 %v1708_v39, %v1707_v38 }
 0x11d   : > { %2092 = vmatmul.mubr.f32.vlgmr.msra.gmra.mrb[4].mxu0 %v2767_v50  ;;  %v1694_v50 = vld [vmem:[%s3108_s4 + $0x1b8] sm:$0xff] }
 0x11e   : > { %2394 = vmatpush3.bf16.msra.mxu0 %v2391_v43  ;;  %2126 = vmatprep.mubr.f32.mxu0 %v708_v44  ;;  %v2403_v63 = vpack.c.bf16 %v1694_v50, %v1693_v59  ;;  %v1663_v43 = vld [vmem:[%s3108_s4 + $0xc0] sm:$0xff]  ;;  %v1664_v44 = vld [vmem:[%s3108_s4 + $0xc8] sm:$0xff]  ;;  %v1713_v50 = vld [vmem:[%s3108_s4 + $0x250] sm:$0xff] }
 0x11f   : > { %2396 = vmatprep.subr.bf16.mxu0 %v2395_v51  ;;  %2274 = vmatpush3.bf16.msra.mxu1 %v2271_v47  ;;  %v1710_v47 = vld [vmem:[%s3108_s4 + $0x238] sm:$0xff]  ;;  %v2311_v48 = vpack.c.bf16 %v1664_v44, %v1663_v43 }
 0x120   : > { %2276 = vmatprep.subr.bf16.mxu1 %v2275_v54  ;;  %v2435_v52 = vpack.c.bf16 %v1710_v47, %v1709_v46  ;;  %v1720_v46 = vld [vmem:[%s3110_s6 + $0x2] ss:$0 sm:$0xff] }
 0x122   : > { %2398 = vmatpush3.bf16.msra.mxu0 %v2395_v51  ;;  %v1666_v51 = vld [vmem:[%s3108_s4 + $0xd8] sm:$0xff] }
 0x123   : > { %2400 = vmatprep.subr.bf16.mxu0 %v2399_v58  ;;  %2278 = vmatpush3.bf16.msra.mxu1 %v2275_v54  ;;  %v1712_v54 = vld [vmem:[%s3108_s4 + $0x248] sm:$0xff]  ;;  %v2315_v55 = vpack.c.bf16 %v1666_v51, %v1665_v49 }
 0x124   : > { %2280 = vmatprep.subr.bf16.mxu1 %v2279_v60  ;;  %v2439_v59 = vpack.c.bf16 %v1712_v54, %v1711_v53 }
 0x126   : > { %2402 = vmatpush3.bf16.msra.mxu0 %v2399_v58  ;;  %v1668_v58 = vld [vmem:[%s3108_s4 + $0xe8] sm:$0xff] }
 0x127   : > { %2404 = vmatprep.subr.bf16.mxu0 %v2403_v63  ;;  %2282 = vmatpush3.bf16.msra.mxu1 %v2279_v60  ;;  %v1714_v60 = vld [vmem:[%s3108_s4 + $0x258] sm:$0xff]  ;;  %v2319_v61 = vpack.c.bf16 %v1668_v58, %v1667_v56 }
 0x128   : > { %2284 = vmatprep.subr.bf16.mxu1 %v2283_v2  ;;  %v2443_v0 = vpack.c.bf16 %v1714_v60, %v1713_v50 }
 0x12a   : > { %2406 = vmatpush3.bf16.msra.mxu0 %v2403_v63  ;;  %v1670_v63 = vld [vmem:[%s3108_s4 + $0xf8] sm:$0xff] }
 0x12b   : > { %2408 = vmatprep.subr.bf16.mxu0 %v2407_v5  ;;  %2286 = vmatpush3.bf16.msra.mxu1 %v2283_v2  ;;  %v1716_v2 = vld [vmem:[%s3108_s4 + $0x268] sm:$0xff]  ;;  %v2323_v3 = vpack.c.bf16 %v1670_v63, %v1669_v62 }
 0x12c   : > { %2288 = vmatprep.subr.bf16.mxu1 %v2287_v8  ;;  %v2447_v7 = vpack.c.bf16 %v1716_v2, %v1715_v1 }
 0x12e   : > { %2410 = vmatpush3.bf16.msra.mxu0 %v2407_v5  ;;  %v1352_v5 = vld [vmem:[%s3109_s5 + $0x8] sm:$0xff] }
 0x12f   : > { %2412 = vmatprep.subr.bf16.mxu0 %v2411_v11  ;;  %2290 = vmatpush3.bf16.msra.mxu1 %v2287_v8  ;;  %v1717_v8 = vld [vmem:[%s3108_s4 + $0x270] sm:$0xff]  ;;  %v2455_v10 = vpack.c.bf16 %v1352_v5, %v1351_v4 }
 0x130   : > { %2292 = vmatprep.subr.bf16.mxu1 %v2291_v14  ;;  %v2451_v15 = vpack.c.bf16 %v1718_v9, %v1717_v8 }
 0x132   : > { %2414 = vmatpush3.bf16.msra.mxu0 %v2411_v11  ;;  %v1353_v11 = vld [vmem:[%s3109_s5 + $0x10] sm:$0xff] }
 0x133   : > { %2416 = vmatprep.subr.bf16.mxu0 %v2415_v17  ;;  %2294 = vmatpush3.bf16.msra.mxu1 %v2291_v14  ;;  %v1344_v14 = vpop.permute.xlu0 %1343  ;;  %v2459_v16 = vpack.c.bf16 %v1354_v12, %v1353_v11 }
 0x134   : > { %2296 = vmatprep.subr.bf16.mxu1 %v2295_v20  ;;  %v1349_v19 = vmax.f32 %v1341_v13, %v1344_v14 }
 0x136   : > { %2418 = vmatpush3.bf16.msra.mxu0 %v2415_v17  ;;  %1987 = vmatmul.mubr.f32.vlgmr.msra.gmra.mrb[0].mxu1 %v709_v28  ;;  %v1355_v17 = vld [vmem:[%s3109_s5 + $0x20] sm:$0xff] }
 0x137   : > { %2420 = vmatprep.subr.bf16.mxu0 %v2419_v23  ;;  %2298 = vmatpush3.bf16.msra.mxu1 %v2295_v20  ;;  %v2463_v26 = vpack.c.bf16 %v1356_v18, %v1355_v17  ;;  %v1357_v20 = vld [vmem:[%s3109_s5 + $0x30] sm:$0xff] }
 0x138   : > { %2021 = vmatprep.mubr.f32.mxu1 %v2781_v57  ;;  %2300 = vmatprep.subr.bf16.mxu1 %v2299_v27  ;;  %v2427_v57 = vpack.c.bf16 %v1706_v34, %v1705_v33 }
 0x13a   : > { %2422 = vmatpush3.bf16.msra.mxu0 %v2419_v23  ;;  %v1197_v23 = vld [vmem:[#allocation2 + $0x12] sm:$0xff] }
 0x13b   : > { %2424 = vmatprep.subr.bf16.mxu0 %v2423_v32  ;;  %2302 = vmatpush3.bf16.msra.mxu1 %v2299_v27  ;;  %v1350_v27 = vmax.f32 %v1342_v25, %v1346_v24 }
 0x13c   : > { %2304 = vmatprep.subr.bf16.mxu1 %v2303_v35 }
 0x13d   : > { %2127 = vmatmul.mubr.f32.vlgmr.msra.gmra.mrb[4].mxu0 %v709_v28  ;;  %v1654_v28 = vld [vmem:[%s3110_s6] ss:$0 sm:$0xff] }
 0x13e   : > { %2426 = vmatpush3.bf16.msra.mxu0 %v2423_v32  ;;  %2161 = vmatprep.mubr.f32.mxu0 %v1196_v42 }
 0x13f   : > { %2428 = vmatprep.subr.bf16.mxu0 %v2427_v57  ;;  %2306 = vmatpush3.bf16.msra.mxu1 %v2303_v35 }
 0x140   : > { %2308 = vmatprep.subr.bf16.mxu1 %v2307_v41 }
 0x142   : > { %2430 = vmatpush3.bf16.msra.mxu0 %v2427_v57  ;;  %v1719_v57 = vld [vmem:[%s3110_s6 + $0x1] ss:$0 sm:$0xff] }
 0x143   : > { %2432 = vmatprep.subr.bf16.mxu0 %v2431_v45  ;;  %2310 = vmatpush3.bf16.msra.mxu1 %v2307_v41 }
 0x144   : > { %2312 = vmatprep.subr.bf16.mxu1 %v2311_v48 }
 0x146   : > { %2434 = vmatpush3.bf16.msra.mxu0 %v2431_v45 }
 0x147   : > { %2436 = vmatprep.subr.bf16.mxu0 %v2435_v52  ;;  %2314 = vmatpush3.bf16.msra.mxu1 %v2311_v48 }
 0x148   : > { %2316 = vmatprep.subr.bf16.mxu1 %v2315_v55 }
 0x14a   : > { %2438 = vmatpush3.bf16.msra.mxu0 %v2435_v52 }
 0x14b   : > { %2440 = vmatprep.subr.bf16.mxu0 %v2439_v59  ;;  %2318 = vmatpush3.bf16.msra.mxu1 %v2315_v55 }
 0x14c   : > { %2320 = vmatprep.subr.bf16.mxu1 %v2319_v61 }
 0x14e   : > { %2442 = vmatpush3.bf16.msra.mxu0 %v2439_v59 }
 0x14f   : > { %2444 = vmatprep.subr.bf16.mxu0 %v2443_v0  ;;  %2322 = vmatpush3.bf16.msra.mxu1 %v2319_v61 }
 0x150   : > { %2324 = vmatprep.subr.bf16.mxu1 %v2323_v3 }
 0x152   : > { %2446 = vmatpush3.bf16.msra.mxu0 %v2443_v0 }
 0x153   : > { %2448 = vmatprep.subr.bf16.mxu0 %v2447_v7  ;;  %2326 = vmatpush3.bf16.msra.mxu1 %v2323_v3 }
 0x154   : > { %2456 = vmatprep.subr.bf16.mxu1 %v2455_v10 }
 0x156   : > { %2450 = vmatpush3.bf16.msra.mxu0 %v2447_v7  ;;  %2022 = vmatmul.mubr.f32.vlgmr.msra.gmra.mrb[2].mxu1 %v2872_v40  ;;  %v2467_v40 = vpack.c.bf16 %v1358_v21, %v1357_v20 }
 0x157   : > { %2452 = vmatprep.subr.bf16.mxu0 %v2451_v15  ;;  %2458 = vmatpush3.bf16.msra.mxu1 %v2455_v10 }
 0x158   : > { %2180 = vmatprep.mubr.msk.f32.mxu1 %vm427_vm3, %v1349_v19  ;;  %2460 = vmatprep.subr.bf16.mxu1 %v2459_v16 }
 0x15a   : > { %2454 = vmatpush3.bf16.msra.mxu0 %v2451_v15 }
 0x15b   : > { %2462 = vmatpush3.bf16.msra.mxu1 %v2459_v16 }
 0x15c   : > { %2464 = vmatprep.subr.bf16.mxu1 %v2463_v26 }
 0x15d   : > { %2162 = vmatmul.mubr.f32.vlgmr.msra.gmra.mrb[4].mxu0 %v1197_v23 }
 0x15f   : > { %2466 = vmatpush3.bf16.msra.mxu1 %v2463_v26 }
 0x160   : > { %2468 = vmatprep.subr.bf16.mxu1 %v2467_v40 }
 0x163   : > { %2470 = vmatpush3.bf16.msra.mxu1 %v2467_v40 }
 0x166   : > { %2181 = vmatmul.mubr.msk.f32.vlgmr.msra.gmra.mrb[4].mxu1 %vm427_vm3, %v1350_v27 }
 0x209   : > { %v1988_v30 = vpop.f32.mrb[0].mxu1 }
 0x20a   : > { %v812_v31 = vadd.f32 %v1988_v30, %v1654_v28  ;;  %v793_v32 = vpop.f32.mrb[1].mxu1 }
 0x20b   : > { %v811_v33 = vadd.f32 %v1654_v28, %v793_v32 }
 0x20c   : > { %v814_v34 = vmax.f32 %v812_v31, 0.0 }
 0x20d   : > { %v813_v35 = vmax.f32 %v811_v33, 0.0 }
 0x20e   : > { %816 = vst [vmem:[%s386_s28 + $0x8] sm:$0xff] %v814_v34 }
 0x20f   : > { %815 = vst [vmem:[%s386_s28] sm:$0xff] %v813_v35 }
 0x229   : > { %v2023_v29 = vpop.f32.mrb[2].mxu1 }
 0x22a   : > { %v920_v36 = vpop.f32.mrb[3].mxu1 }
 0x230   : > { %v2163_v37 = vpop.f32.mrb[4].mxu0 }
 0x231   : > { %v2471_v38 = vadd.f32 %v2163_v37, %v2023_v29  ;;  %v1281_v39 = vpop.f32.mrb[5].mxu0 }
 0x232   : > { %v2472_v41 = vadd.f32 %v1281_v39, %v920_v36 }
 0x233   : > { %v1300_v42 = vadd.f32 %v2471_v38, %v1719_v57 }
 0x234   : > { %v1299_v43 = vadd.f32 %v2472_v41, %v1719_v57 }
 0x235   : > { %v1302_v44 = vmax.f32 %v1300_v42, 0.0 }
 0x236   : > { %v1301_v45 = vmax.f32 %v1299_v43, 0.0 }
 0x237   : > { %1304 = vst [vmem:[%s391_s15 + $0x8] sm:$0xff] %v1302_v44 }
 0x238   : > { %1303 = vst [vmem:[%s391_s15] sm:$0xff] %v1301_v45 }
 0x239   : > { %v2182_v47 = vpop.f32.mrb[4].mxu1 }
 0x23a   : > { %v1444_v48 = vadd.f32 %v2182_v47, %v1720_v46  ;;  %v1438_v49 = vpop.f32.mrb[5].mxu1 }
 0x23b   : > { %v1439_v51 = vadd.f32 %v1720_v46, %v1438_v49 }
 0x23c   : > { %v1448_v52 = vmax.f32 %v1444_v48, 0.0 }
 0x23d   : > { %v1447_v53 = vmax.f32 %v1439_v51, 0.0 }
 0x23e   : > { %1450 = vst [vmem:[%s396_s21 + $0x8] sm:$0xff] %v1448_v52 }
 0x23f   : > { %1449 = vst [vmem:[%s396_s21] sm:$0xff] %v1447_v53 }
 0x240 PF: > { %s21_s13 = sadd.s32 1, %s2502_s13  }
 0x241   : > { %p18_p4 = scmp.ge.s32.totalorder %s21_s13, 4  }
 0x243   :  { %20 = sbr.rel (!%p18_p4) target bundleno = 1 (0x1), region = 120 }

</bundles_post_ra>
